<compile_context>
chip_gen: v6e
topology: v6e:2x2x1
jax: 0.10.0
libtpu: 0.0.40
codegen_flags: <defaults>
</compile_context>

<pallas_src>
import jax
import jax.numpy as jnp
from jax.experimental import pallas as pl
from jax.experimental.pallas import tpu as pltpu

KSIZE = 7
PAD = 3
HALO = 8                      # sublane-aligned halo (>= PAD)
C_IN = 1024
C_HID = 32
C_D3, C_D8, C_DISO = 3, 8, 2
C_REAL = C_D3 + C_D8 + C_DISO  # 13 real head channels
C_HEAD = 16                    # padded to 16
N1 = KSIZE * C_HID             # 224: conv1 taps packed along lanes
N2 = KSIZE * C_HEAD            # 112: fused-head taps packed along lanes


def _pick_chunk(L):
    """Stage-1 dot M-chunk: a divisor of L, multiple of 8, at most 256 rows."""
    if L <= 256:
        return L
    for c in range(256, 7, -8):
        if L % c == 0:
            return c
    return L


def convnet_kernel(x_ref, w1h_ref, w1l_ref, b1_ref, wh_ref, bh_ref,
                   out_ref, y1p_ref):
    """One batch-block (TB elements) per grid step.

    x_ref   : (TB, L, 1024) f32   unpadded input slab (channels on lanes)
    w1h_ref : (1024, 224)  bf16   conv1 weights, hi half, 7 taps along cout
    w1l_ref : (1024, 224)  bf16   conv1 weights, lo half
    b1_ref  : (1, 32)      f32
    wh_ref  : (32, 112)    f32    fused d3/d8/diso weights, 7 taps * 16 cout
    bh_ref  : (1, 16)      f32
    out_ref : (TB, L, 16)  f32    fused head output (13 real channels)
    y1p_ref : (TB, L+16, 224) f32 scratch: conv1 matmul result w/ halo rows
    """
    TB, L, _ = x_ref.shape
    P = HALO
    ch = _pick_chunk(L)

    # Zero only the 2*HALO halo slabs (a few vregs).  Done every step so the
    # kernel stays correct when the batch grid axis is sharded across cores
    # (scratch is per-core).
    y1p_ref[:, 0:P, :] = jnp.zeros((TB, P, N1), jnp.float32)
    y1p_ref[:, P + L:P + L + P, :] = jnp.zeros((TB, P, N1), jnp.float32)

    # ---- Stage 1: Conv2d(1024 -> 32, (7,1), pad (3,0)) matmul --------------
    # bf16x3 split-precision dot (3 MXU passes, ~f32 accuracy):
    #   x = xh + xl, w = wh + wl, x@w ~= xh@wh + xl@wh + xh@wl.
    # Chunked along L and written straight into the halo scratch so the dot
    # temporary never co-resides with the full scratch (peak-VMEM cut).
    for i in range(L // ch):
        c0 = i * ch
        xc = x_ref[:, c0:c0 + ch, :].reshape(TB * ch, C_IN)
        x_hi = xc.astype(jnp.bfloat16)
        x_lo = (xc - x_hi.astype(jnp.float32)).astype(jnp.bfloat16)
        acc = jnp.dot(x_hi, w1h_ref[...], preferred_element_type=jnp.float32)
        acc = acc + jnp.dot(x_lo, w1h_ref[...],
                            preferred_element_type=jnp.float32)
        acc = acc + jnp.dot(x_hi, w1l_ref[...],
                            preferred_element_type=jnp.float32)
        y1p_ref[:, P + c0:P + c0 + ch, :] = acc.reshape(TB, ch, N1)

    # ---- Stage 1 tap-sum + bias + ReLU -------------------------------------
    # h[b, l, c] = sum_k y1p[b, (P - PAD) + l + k, 32k:32k+32]
    h = jnp.zeros((TB, L, C_HID), jnp.float32)
    for k in range(KSIZE):
        r0 = P - PAD + k
        h = h + y1p_ref[:, r0:r0 + L, k * C_HID:(k + 1) * C_HID]
    h = jnp.maximum(h + b1_ref[...].reshape(1, 1, C_HID), 0.0)
    # Dropout(p=0.25): identity in eval-mode forward.

    # ---- Stage 2: fused dssp3 / dssp8 / diso heads, Conv2d(32 -> 13->16) ---
    # No scratch round-trip: one small f32 dot, then the 7 shifted tap adds
    # are sublane rolls (XLU) + iota edge masks (VPU) on the in-register y2.
    y2 = jnp.dot(h.reshape(TB * L, C_HID), wh_ref[...],
                 preferred_element_type=jnp.float32)
    y2 = y2.reshape(TB, L, N2)
    pos = jax.lax.broadcasted_iota(jnp.int32, (TB, L, C_HEAD), 1)
    o = jnp.zeros((TB, L, C_HEAD), jnp.float32)
    for k in range(KSIZE):
        d = k - PAD                                    # out[l] needs y2[l + d]
        tap = y2[:, :, k * C_HEAD:(k + 1) * C_HEAD]
        if d == 0:
            o = o + tap
        else:
            tap = pltpu.roll(tap, shift=(-d) % L, axis=1)
            src = pos + d
            o = o + jnp.where((src >= 0) & (src < L), tap, 0.0)
    out_ref[...] = o + bh_ref[...].reshape(1, 1, C_HEAD)


def _vmem_capacity_bytes():
    """Per-core VMEM capacity (64 MiB v7x, 128 MiB v5e/v6e); safe fallback."""
    try:
        info = pltpu.get_tpu_info()
        cap = int(getattr(info, "vmem_capacity_bytes", 0))
        if cap > 0:
            return cap
    except Exception:
        pass
    return 64 << 20


def _estimate_vmem(TB, L):
    """Approximate per-grid-step scoped-VMEM bytes (incl. dot temporaries and
    the lane-padded (..,16)->(..,128) output double buffer)."""
    ch = _pick_chunk(L)
    x_dbuf = 2 * TB * L * C_IN * 4
    out_dbuf = 2 * TB * L * 128 * 4
    y1p = TB * (L + 2 * HALO) * N1 * 4
    s1_tmp = TB * ch * (C_IN * 4 + 2 * C_IN * 2 + N1 * 4)  # x f32 + hi/lo bf16 + acc
    s2_tmp = TB * L * (C_HID * 4 + N2 * 4 + 2 * 128 * 4)   # h + y2 + o / roll temps
    weights = 2 * (2 * C_IN * N1 * 2 + C_HID * N2 * 4) + 4 * 8 * 128 * 4
    return x_dbuf + out_dbuf + y1p + s1_tmp + s2_tmp + weights


def _pick_tb(B, L, vmem_cap):
    """Largest divisor of B that fits ~75% of VMEM while keeping the grid at
    least min(B, 4) steps (megacore sharding on v7x + DMA/compute overlap)."""
    if L % 8 != 0:
        return 1          # keep in-kernel leading-dim reshapes layout-trivial
    budget = int(0.75 * vmem_cap)
    tb = max(1, min(B, B // min(B, 4)))
    while tb > 1 and (B % tb != 0 or _estimate_vmem(tb, L) > budget):
        tb -= 1
    return max(tb, 1)


def _pack_params(params):
    """Pack torch-style (k, cin, cout) conv weights into wide MXU RHS."""
    w1, b1, w3, b3, w8, b8, wd, bd = params
    # conv1: (7, 1024, 32) -> (1024, 7*32); lane block k holds tap k.
    # Split into bf16 hi/lo halves for the in-kernel bf16x3 dot.
    w1c = jnp.transpose(w1, (1, 0, 2)).reshape(C_IN, N1)
    w1h = w1c.astype(jnp.bfloat16)
    w1l = (w1c - w1h.astype(jnp.float32)).astype(jnp.bfloat16)
    # heads: concat (3|8|2) along cout, pad to 16, pack taps along lanes.
    wh = jnp.concatenate([w3, w8, wd], axis=2)               # (7, 32, 13)
    wh = jnp.pad(wh, ((0, 0), (0, 0), (0, C_HEAD - C_REAL)))
    whc = jnp.transpose(wh, (1, 0, 2)).reshape(C_HID, N2)    # (32, 112)
    bh = jnp.concatenate([b3, b8, bd], axis=1)                # (1, 13)
    bh = jnp.pad(bh, ((0, 0), (0, C_HEAD - C_REAL)))
    return w1h, w1l, b1, whc, bh


def convnet_forward(x, params):
    """x: (B, L, 1024) f32 -> (d3 (B,L,3), d8 (B,L,8), diso (B,L,2))."""
    B, L, _ = x.shape
    w1h, w1l, b1, whc, bh = _pack_params(params)

    vmem_cap = _vmem_capacity_bytes()
    TB = _pick_tb(B, L, vmem_cap)
    grid = (B // TB,)
    vmem_limit = int(0.9 * vmem_cap)

    grid_spec = pltpu.PrefetchScalarGridSpec(
        num_scalar_prefetch=0,
        grid=grid,
        in_specs=[
            pl.BlockSpec((TB, L, C_IN), lambda b: (b, 0, 0)),
            pl.BlockSpec((C_IN, N1), lambda b: (0, 0)),
            pl.BlockSpec((C_IN, N1), lambda b: (0, 0)),
            pl.BlockSpec((1, C_HID), lambda b: (0, 0)),
            pl.BlockSpec((C_HID, N2), lambda b: (0, 0)),
            pl.BlockSpec((1, C_HEAD), lambda b: (0, 0)),
        ],
        out_specs=pl.BlockSpec((TB, L, C_HEAD), lambda b: (b, 0, 0)),
        scratch_shapes=[
            pltpu.VMEM((TB, L + 2 * HALO, N1), jnp.float32),
        ],
    )

    fused = pl.pallas_call(
        convnet_kernel,
        out_shape=jax.ShapeDtypeStruct((B, L, C_HEAD), jnp.float32),
        grid_spec=grid_spec,
        compiler_params=pltpu.CompilerParams(
            dimension_semantics=("parallel",),
            vmem_limit_bytes=vmem_limit),
    )(x, w1h, w1l, b1, whc, bh)

    d3 = fused[..., :C_D3]
    d8 = fused[..., C_D3:C_D3 + C_D8]
    diso = fused[..., C_D3 + C_D8:C_REAL]
    return d3, d8, diso


def init_params(key):
    """Deterministic synthetic weights matching the torch Conv2d shapes.

    torch Conv2d weight is (Cout, Cin, 7, 1); we store (7, Cin, Cout)."""
    def conv_init(k, cin, cout):
        kw, kb = jax.random.split(k)
        bound = 1.0 / jnp.sqrt(cin * KSIZE * 1.0)
        w = jax.random.uniform(kw, (KSIZE, cin, cout), jnp.float32, -bound, bound)
        b = jax.random.uniform(kb, (1, cout), jnp.float32, -bound, bound)
        return w, b

    k1, k3, k8, kd = jax.random.split(key, 4)
    w1, b1 = conv_init(k1, C_IN, C_HID)
    w3, b3 = conv_init(k3, C_HID, C_D3)
    w8, b8 = conv_init(k8, C_HID, C_D8)
    wd, bd = conv_init(kd, C_HID, C_DISO)
    return (w1, b1, w3, b3, w8, b8, wd, bd)


def reference_forward(x, params):
    """Pure-JAX reference mirroring the exact torch NCHW Conv2d semantics."""
    w1, b1, w3, b3, w8, b8, wd, bd = params
    x_nchw = jnp.transpose(x, (0, 2, 1))[..., None]          # (B, 1024, L, 1)

    def conv(inp, w_kio, b):
        w = jnp.transpose(w_kio, (2, 1, 0))[..., None]        # OIHW
        y = jax.lax.conv_general_dilated(
            inp, w, window_strides=(1, 1),
            padding=((PAD, PAD), (0, 0)),
            dimension_numbers=('NCHW', 'OIHW', 'NCHW'),
            precision=jax.lax.Precision.HIGHEST)
        return y + b.reshape(1, -1, 1, 1)

    h = jnp.maximum(conv(x_nchw, w1, b1), 0.0)

    def head(w, b):
        y = conv(h, w, b)                                     # (B, C, L, 1)
        return jnp.transpose(y[..., 0], (0, 2, 1))            # (B, L, C)

    return head(w3, b3), head(w8, b8), head(wd, bd)


if __name__ == "__main__":
    key = jax.random.PRNGKey(0)
    kx, kp = jax.random.split(key)

    B, L = 2, 8                      # small shapes: batch=2, seq=8, embed=1024
    x = jax.random.normal(kx, (B, L, C_IN), dtype=jnp.float32)
    params = init_params(kp)

    d3, d8, diso = jax.block_until_ready(convnet_forward(x, params))

    r3, r8, rdiso = reference_forward(x, params)
    assert d3.shape == (B, L, C_D3) and d8.shape == (B, L, C_D8) \
        and diso.shape == (B, L, C_DISO)
    assert jnp.allclose(d3, r3, atol=1e-4, rtol=1e-4)
    assert jnp.allclose(d8, r8, atol=1e-4, rtol=1e-4)
    assert jnp.allclose(diso, rdiso, atol=1e-4, rtol=1e-4)

    print("KERNEL_OK")
</pallas_src>

<mosaic_0001>
module attributes {stable_mosaic.version = 11 : i64} {
  func.func @convnet_kernel(%arg0: i32, %arg1: memref<1x8x1024xf32, #tpu.memory_space<vmem>>, %arg2: memref<1024x224xbf16, #tpu.memory_space<vmem>>, %arg3: memref<1024x224xbf16, #tpu.memory_space<vmem>>, %arg4: memref<1x32xf32, #tpu.memory_space<vmem>>, %arg5: memref<32x112xf32, #tpu.memory_space<vmem>>, %arg6: memref<1x16xf32, #tpu.memory_space<vmem>>, %arg7: memref<1x8x16xf32, #tpu.memory_space<vmem>>, %arg8: memref<1x24x224xf32, #tpu.memory_space<vmem>>) attributes {dimension_semantics = [#tpu.dimension_semantics<parallel>], iteration_bounds = array<i64: 2>, scalar_prefetch = 0 : i64, scratch_operands = 1 : i64, tpu.core_type = #tpu.core_type<tc>, window_params = [{transform_indices = @transform_0, window_bounds = array<i64: 1, 8, 1024>}, {pipeline_mode = #tpu.pipeline_mode<synchronous>, transform_indices = @transform_1, window_bounds = array<i64: 1024, 224>}, {pipeline_mode = #tpu.pipeline_mode<synchronous>, transform_indices = @transform_2, window_bounds = array<i64: 1024, 224>}, {pipeline_mode = #tpu.pipeline_mode<synchronous>, transform_indices = @transform_3, window_bounds = array<i64: 1, 32>}, {pipeline_mode = #tpu.pipeline_mode<synchronous>, transform_indices = @transform_4, window_bounds = array<i64: 32, 112>}, {pipeline_mode = #tpu.pipeline_mode<synchronous>, transform_indices = @transform_5, window_bounds = array<i64: 1, 16>}, {transform_indices = @transform_6, window_bounds = array<i64: 1, 8, 16>}]} {
    %cst = arith.constant 0.000000e+00 : f32
    %0 = vector.broadcast %cst : f32 to vector<1x8x224xf32>
    %c0 = arith.constant 0 : index
    %c0_0 = arith.constant 0 : index
    %c0_1 = arith.constant 0 : index
    %1 = vector.load %arg8[%c0, %c0_0, %c0_1] : memref<1x24x224xf32, #tpu.memory_space<vmem>>, vector<1x8x224xf32>
    tpu.vector_store %arg8[%c0, %c0_0, %c0_1], %0 {strides = array<i32>} : memref<1x24x224xf32, #tpu.memory_space<vmem>>, vector<1x8x224xf32>,
    %cst_2 = arith.constant 0.000000e+00 : f32
    %2 = vector.broadcast %cst_2 : f32 to vector<1x8x224xf32>
    %c0_3 = arith.constant 0 : index
    %c16 = arith.constant 16 : index
    %c0_4 = arith.constant 0 : index
    %3 = vector.load %arg8[%c0_3, %c16, %c0_4] : memref<1x24x224xf32, #tpu.memory_space<vmem>>, vector<1x8x224xf32>
    tpu.vector_store %arg8[%c0_3, %c16, %c0_4], %2 {strides = array<i32>} : memref<1x24x224xf32, #tpu.memory_space<vmem>>, vector<1x8x224xf32>,
    %c0_5 = arith.constant 0 : index
    %c0_6 = arith.constant 0 : index
    %c0_7 = arith.constant 0 : index
    %4 = vector.load %arg1[%c0_5, %c0_6, %c0_7] : memref<1x8x1024xf32, #tpu.memory_space<vmem>>, vector<1x8x1024xf32>
    %5 = vector.shape_cast %4 : vector<1x8x1024xf32> to vector<8x1024xf32>
    %6 = arith.truncf %5 : vector<8x1024xf32> to vector<8x1024xbf16>
    %7 = arith.extf %6 : vector<8x1024xbf16> to vector<8x1024xf32>
    %8 = arith.subf %5, %7 : vector<8x1024xf32>
    %9 = arith.truncf %8 : vector<8x1024xf32> to vector<8x1024xbf16>
    %c0_8 = arith.constant 0 : index
    %c0_9 = arith.constant 0 : index
    %10 = vector.load %arg2[%c0_8, %c0_9] : memref<1024x224xbf16, #tpu.memory_space<vmem>>, vector<1024x224xbf16>
    %cst_10 = arith.constant dense<0.000000e+00> : vector<8x224xf32>
    %11 = tpu.matmul %6, %10, %cst_10 {dimension_numbers = #tpu.dot_dimension_numbers<[1], [0], [0], [1], [0, 0, 1, 1], [], []>} : vector<8x1024xbf16>, vector<1024x224xbf16>, vector<8x224xf32> -> vector<8x224xf32>
    %c0_11 = arith.constant 0 : index
    %c0_12 = arith.constant 0 : index
    %12 = vector.load %arg2[%c0_11, %c0_12] : memref<1024x224xbf16, #tpu.memory_space<vmem>>, vector<1024x224xbf16>
    %cst_13 = arith.constant dense<0.000000e+00> : vector<8x224xf32>
    %13 = tpu.matmul %9, %12, %cst_13 {dimension_numbers = #tpu.dot_dimension_numbers<[1], [0], [0], [1], [0, 0, 1, 1], [], []>} : vector<8x1024xbf16>, vector<1024x224xbf16>, vector<8x224xf32> -> vector<8x224xf32>
    %14 = arith.addf %11, %13 : vector<8x224xf32>
    %c0_14 = arith.constant 0 : index
    %c0_15 = arith.constant 0 : index
    %15 = vector.load %arg3[%c0_14, %c0_15] : memref<1024x224xbf16, #tpu.memory_space<vmem>>, vector<1024x224xbf16>
    %cst_16 = arith.constant dense<0.000000e+00> : vector<8x224xf32>
    %16 = tpu.matmul %6, %15, %cst_16 {dimension_numbers = #tpu.dot_dimension_numbers<[1], [0], [0], [1], [0, 0, 1, 1], [], []>} : vector<8x1024xbf16>, vector<1024x224xbf16>, vector<8x224xf32> -> vector<8x224xf32>
    %17 = arith.addf %14, %16 : vector<8x224xf32>
    %18 = vector.shape_cast %17 : vector<8x224xf32> to vector<1x8x224xf32>
    %c0_17 = arith.constant 0 : index
    %c8 = arith.constant 8 : index
    %c0_18 = arith.constant 0 : index
    %19 = vector.load %arg8[%c0_17, %c8, %c0_18] : memref<1x24x224xf32, #tpu.memory_space<vmem>>, vector<1x8x224xf32>
    tpu.vector_store %arg8[%c0_17, %c8, %c0_18], %18 {strides = array<i32>} : memref<1x24x224xf32, #tpu.memory_space<vmem>>, vector<1x8x224xf32>,
    %cst_19 = arith.constant 0.000000e+00 : f32
    %20 = vector.broadcast %cst_19 : f32 to vector<1x8x32xf32>
    %c0_20 = arith.constant 0 : index
    %c5 = arith.constant 5 : index
    %c0_21 = arith.constant 0 : index
    %21 = vector.load %arg8[%c0_20, %c5, %c0_21] : memref<1x24x224xf32, #tpu.memory_space<vmem>>, vector<1x8x32xf32>
    %22 = arith.addf %20, %21 : vector<1x8x32xf32>
    %c0_22 = arith.constant 0 : index
    %c6 = arith.constant 6 : index
    %c32 = arith.constant 32 : index
    %23 = vector.load %arg8[%c0_22, %c6, %c32] : memref<1x24x224xf32, #tpu.memory_space<vmem>>, vector<1x8x32xf32>
    %24 = arith.addf %22, %23 : vector<1x8x32xf32>
    %c0_23 = arith.constant 0 : index
    %c7 = arith.constant 7 : index
    %c64 = arith.constant 64 : index
    %25 = vector.load %arg8[%c0_23, %c7, %c64] : memref<1x24x224xf32, #tpu.memory_space<vmem>>, vector<1x8x32xf32>
    %26 = arith.addf %24, %25 : vector<1x8x32xf32>
    %c0_24 = arith.constant 0 : index
    %c8_25 = arith.constant 8 : index
    %c96 = arith.constant 96 : index
    %27 = vector.load %arg8[%c0_24, %c8_25, %c96] : memref<1x24x224xf32, #tpu.memory_space<vmem>>, vector<1x8x32xf32>
    %28 = arith.addf %26, %27 : vector<1x8x32xf32>
    %c0_26 = arith.constant 0 : index
    %c9 = arith.constant 9 : index
    %c128 = arith.constant 128 : index
    %29 = vector.load %arg8[%c0_26, %c9, %c128] : memref<1x24x224xf32, #tpu.memory_space<vmem>>, vector<1x8x32xf32>
    %30 = arith.addf %28, %29 : vector<1x8x32xf32>
    %c0_27 = arith.constant 0 : index
    %c10 = arith.constant 10 : index
    %c160 = arith.constant 160 : index
    %31 = vector.load %arg8[%c0_27, %c10, %c160] : memref<1x24x224xf32, #tpu.memory_space<vmem>>, vector<1x8x32xf32>
    %32 = arith.addf %30, %31 : vector<1x8x32xf32>
    %c0_28 = arith.constant 0 : index
    %c11 = arith.constant 11 : index
    %c192 = arith.constant 192 : index
    %33 = vector.load %arg8[%c0_28, %c11, %c192] : memref<1x24x224xf32, #tpu.memory_space<vmem>>, vector<1x8x32xf32>
    %34 = arith.addf %32, %33 : vector<1x8x32xf32>
    %c0_29 = arith.constant 0 : index
    %c0_30 = arith.constant 0 : index
    %35 = vector.load %arg4[%c0_29, %c0_30] : memref<1x32xf32, #tpu.memory_space<vmem>>, vector<1x32xf32>
    %36 = vector.shape_cast %35 : vector<1x32xf32> to vector<1x1x32xf32>
    %37 = vector.broadcast %36 : vector<1x1x32xf32> to vector<1x8x32xf32>
    %38 = arith.addf %34, %37 : vector<1x8x32xf32>
    %cst_31 = arith.constant 0.000000e+00 : f32
    %39 = vector.broadcast %cst_31 : f32 to vector<1x8x32xf32>
    %40 = arith.maximumf %38, %39 : vector<1x8x32xf32>
    %41 = vector.shape_cast %40 : vector<1x8x32xf32> to vector<8x32xf32>
    %c0_32 = arith.constant 0 : index
    %c0_33 = arith.constant 0 : index
    %42 = vector.load %arg5[%c0_32, %c0_33] : memref<32x112xf32, #tpu.memory_space<vmem>>, vector<32x112xf32>
    %cst_34 = arith.constant dense<0.000000e+00> : vector<8x112xf32>
    %43 = tpu.matmul %41, %42, %cst_34 {dimension_numbers = #tpu.dot_dimension_numbers<[1], [0], [0], [1], [0, 0, 1, 1], [], []>} : vector<8x32xf32>, vector<32x112xf32>, vector<8x112xf32> -> vector<8x112xf32>
    %44 = vector.shape_cast %43 : vector<8x112xf32> to vector<1x8x112xf32>
    %45 = tpu.iota {dimensions = array<i32: 1>} : vector<1x8x16xi32>
    %cst_35 = arith.constant 0.000000e+00 : f32
    %46 = vector.broadcast %cst_35 : f32 to vector<1x8x16xf32>
    %47 = vector.extract_strided_slice %44 {offsets = [0, 0, 0], sizes = [1, 8, 16], strides = [1, 1, 1]} : vector<1x8x112xf32> to vector<1x8x16xf32>
    %c3_i32 = arith.constant 3 : i32
    %48 = tpu.dynamic_rotate %47 by %c3_i32 dim 1 : vector<1x8x16xf32>, i32 -> vector<1x8x16xf32>
    %c-3_i32 = arith.constant -3 : i32
    %49 = vector.broadcast %c-3_i32 : i32 to vector<1x8x16xi32>
    %50 = arith.addi %45, %49 : vector<1x8x16xi32>
    %c0_i32 = arith.constant 0 : i32
    %51 = vector.broadcast %c0_i32 : i32 to vector<1x8x16xi32>
    %52 = arith.cmpi sge, %50, %51 : vector<1x8x16xi32>
    %c8_i32 = arith.constant 8 : i32
    %53 = vector.broadcast %c8_i32 : i32 to vector<1x8x16xi32>
    %54 = arith.cmpi slt, %50, %53 : vector<1x8x16xi32>
    %55 = arith.andi %52, %54 : vector<1x8x16xi1>
    %cst_36 = arith.constant 0.000000e+00 : f32
    %56 = vector.broadcast %cst_36 : f32 to vector<1x8x16xf32>
    %57 = arith.select %55, %48, %56 : vector<1x8x16xi1>, vector<1x8x16xf32>
    %58 = arith.addf %46, %57 : vector<1x8x16xf32>
    %59 = vector.extract_strided_slice %44 {offsets = [0, 0, 16], sizes = [1, 8, 16], strides = [1, 1, 1]} : vector<1x8x112xf32> to vector<1x8x16xf32>
    %c2_i32 = arith.constant 2 : i32
    %60 = tpu.dynamic_rotate %59 by %c2_i32 dim 1 : vector<1x8x16xf32>, i32 -> vector<1x8x16xf32>
    %c-2_i32 = arith.constant -2 : i32
    %61 = vector.broadcast %c-2_i32 : i32 to vector<1x8x16xi32>
    %62 = arith.addi %45, %61 : vector<1x8x16xi32>
    %c0_i32_37 = arith.constant 0 : i32
    %63 = vector.broadcast %c0_i32_37 : i32 to vector<1x8x16xi32>
    %64 = arith.cmpi sge, %62, %63 : vector<1x8x16xi32>
    %c8_i32_38 = arith.constant 8 : i32
    %65 = vector.broadcast %c8_i32_38 : i32 to vector<1x8x16xi32>
    %66 = arith.cmpi slt, %62, %65 : vector<1x8x16xi32>
    %67 = arith.andi %64, %66 : vector<1x8x16xi1>
    %cst_39 = arith.constant 0.000000e+00 : f32
    %68 = vector.broadcast %cst_39 : f32 to vector<1x8x16xf32>
    %69 = arith.select %67, %60, %68 : vector<1x8x16xi1>, vector<1x8x16xf32>
    %70 = arith.addf %58, %69 : vector<1x8x16xf32>
    %71 = vector.extract_strided_slice %44 {offsets = [0, 0, 32], sizes = [1, 8, 16], strides = [1, 1, 1]} : vector<1x8x112xf32> to vector<1x8x16xf32>
    %c1_i32 = arith.constant 1 : i32
    %72 = tpu.dynamic_rotate %71 by %c1_i32 dim 1 : vector<1x8x16xf32>, i32 -> vector<1x8x16xf32>
    %c-1_i32 = arith.constant -1 : i32
    %73 = vector.broadcast %c-1_i32 : i32 to vector<1x8x16xi32>
    %74 = arith.addi %45, %73 : vector<1x8x16xi32>
    %c0_i32_40 = arith.constant 0 : i32
    %75 = vector.broadcast %c0_i32_40 : i32 to vector<1x8x16xi32>
    %76 = arith.cmpi sge, %74, %75 : vector<1x8x16xi32>
    %c8_i32_41 = arith.constant 8 : i32
    %77 = vector.broadcast %c8_i32_41 : i32 to vector<1x8x16xi32>
    %78 = arith.cmpi slt, %74, %77 : vector<1x8x16xi32>
    %79 = arith.andi %76, %78 : vector<1x8x16xi1>
    %cst_42 = arith.constant 0.000000e+00 : f32
    %80 = vector.broadcast %cst_42 : f32 to vector<1x8x16xf32>
    %81 = arith.select %79, %72, %80 : vector<1x8x16xi1>, vector<1x8x16xf32>
    %82 = arith.addf %70, %81 : vector<1x8x16xf32>
    %83 = vector.extract_strided_slice %44 {offsets = [0, 0, 48], sizes = [1, 8, 16], strides = [1, 1, 1]} : vector<1x8x112xf32> to vector<1x8x16xf32>
    %84 = arith.addf %82, %83 : vector<1x8x16xf32>
    %85 = vector.extract_strided_slice %44 {offsets = [0, 0, 64], sizes = [1, 8, 16], strides = [1, 1, 1]} : vector<1x8x112xf32> to vector<1x8x16xf32>
    %c7_i32 = arith.constant 7 : i32
    %86 = tpu.dynamic_rotate %85 by %c7_i32 dim 1 : vector<1x8x16xf32>, i32 -> vector<1x8x16xf32>
    %c1_i32_43 = arith.constant 1 : i32
    %87 = vector.broadcast %c1_i32_43 : i32 to vector<1x8x16xi32>
    %88 = arith.addi %45, %87 : vector<1x8x16xi32>
    %c0_i32_44 = arith.constant 0 : i32
    %89 = vector.broadcast %c0_i32_44 : i32 to vector<1x8x16xi32>
    %90 = arith.cmpi sge, %88, %89 : vector<1x8x16xi32>
    %c8_i32_45 = arith.constant 8 : i32
    %91 = vector.broadcast %c8_i32_45 : i32 to vector<1x8x16xi32>
    %92 = arith.cmpi slt, %88, %91 : vector<1x8x16xi32>
    %93 = arith.andi %90, %92 : vector<1x8x16xi1>
    %cst_46 = arith.constant 0.000000e+00 : f32
    %94 = vector.broadcast %cst_46 : f32 to vector<1x8x16xf32>
    %95 = arith.select %93, %86, %94 : vector<1x8x16xi1>, vector<1x8x16xf32>
    %96 = arith.addf %84, %95 : vector<1x8x16xf32>
    %97 = vector.extract_strided_slice %44 {offsets = [0, 0, 80], sizes = [1, 8, 16], strides = [1, 1, 1]} : vector<1x8x112xf32> to vector<1x8x16xf32>
    %c6_i32 = arith.constant 6 : i32
    %98 = tpu.dynamic_rotate %97 by %c6_i32 dim 1 : vector<1x8x16xf32>, i32 -> vector<1x8x16xf32>
    %c2_i32_47 = arith.constant 2 : i32
    %99 = vector.broadcast %c2_i32_47 : i32 to vector<1x8x16xi32>
    %100 = arith.addi %45, %99 : vector<1x8x16xi32>
    %c0_i32_48 = arith.constant 0 : i32
    %101 = vector.broadcast %c0_i32_48 : i32 to vector<1x8x16xi32>
    %102 = arith.cmpi sge, %100, %101 : vector<1x8x16xi32>
    %c8_i32_49 = arith.constant 8 : i32
    %103 = vector.broadcast %c8_i32_49 : i32 to vector<1x8x16xi32>
    %104 = arith.cmpi slt, %100, %103 : vector<1x8x16xi32>
    %105 = arith.andi %102, %104 : vector<1x8x16xi1>
    %cst_50 = arith.constant 0.000000e+00 : f32
    %106 = vector.broadcast %cst_50 : f32 to vector<1x8x16xf32>
    %107 = arith.select %105, %98, %106 : vector<1x8x16xi1>, vector<1x8x16xf32>
    %108 = arith.addf %96, %107 : vector<1x8x16xf32>
    %109 = vector.extract_strided_slice %44 {offsets = [0, 0, 96], sizes = [1, 8, 16], strides = [1, 1, 1]} : vector<1x8x112xf32> to vector<1x8x16xf32>
    %c5_i32 = arith.constant 5 : i32
    %110 = tpu.dynamic_rotate %109 by %c5_i32 dim 1 : vector<1x8x16xf32>, i32 -> vector<1x8x16xf32>
    %c3_i32_51 = arith.constant 3 : i32
    %111 = vector.broadcast %c3_i32_51 : i32 to vector<1x8x16xi32>
    %112 = arith.addi %45, %111 : vector<1x8x16xi32>
    %c0_i32_52 = arith.constant 0 : i32
    %113 = vector.broadcast %c0_i32_52 : i32 to vector<1x8x16xi32>
    %114 = arith.cmpi sge, %112, %113 : vector<1x8x16xi32>
    %c8_i32_53 = arith.constant 8 : i32
    %115 = vector.broadcast %c8_i32_53 : i32 to vector<1x8x16xi32>
    %116 = arith.cmpi slt, %112, %115 : vector<1x8x16xi32>
    %117 = arith.andi %114, %116 : vector<1x8x16xi1>
    %cst_54 = arith.constant 0.000000e+00 : f32
    %118 = vector.broadcast %cst_54 : f32 to vector<1x8x16xf32>
    %119 = arith.select %117, %110, %118 : vector<1x8x16xi1>, vector<1x8x16xf32>
    %120 = arith.addf %108, %119 : vector<1x8x16xf32>
    %c0_55 = arith.constant 0 : index
    %c0_56 = arith.constant 0 : index
    %121 = vector.load %arg6[%c0_55, %c0_56] : memref<1x16xf32, #tpu.memory_space<vmem>>, vector<1x16xf32>
    %122 = vector.shape_cast %121 : vector<1x16xf32> to vector<1x1x16xf32>
    %123 = vector.broadcast %122 : vector<1x1x16xf32> to vector<1x8x16xf32>
    %124 = arith.addf %120, %123 : vector<1x8x16xf32>
    %c0_57 = arith.constant 0 : index
    %c0_58 = arith.constant 0 : index
    %c0_59 = arith.constant 0 : index
    %125 = vector.load %arg7[%c0_57, %c0_58, %c0_59] : memref<1x8x16xf32, #tpu.memory_space<vmem>>, vector<1x8x16xf32>
    tpu.vector_store %arg7[%c0_57, %c0_58, %c0_59], %124 {strides = array<i32>} : memref<1x8x16xf32, #tpu.memory_space<vmem>>, vector<1x8x16xf32>,
    return
  }
  func.func @transform_0(%arg0: i32) -> (i32, i32, i32) {
    %c0_i32 = arith.constant 0 : i32
    %c0_i32_0 = arith.constant 0 : i32
    %c0_i32_1 = arith.constant 0 : i32
    return %arg0, %c0_i32, %c0_i32_0 : i32, i32, i32
  }
  func.func @transform_1(%arg0: i32) -> (i32, i32) {
    %c0_i32 = arith.constant 0 : i32
    %c0_i32_0 = arith.constant 0 : i32
    %c0_i32_1 = arith.constant 0 : i32
    return %c0_i32, %c0_i32_0 : i32, i32
  }
  func.func @transform_2(%arg0: i32) -> (i32, i32) {
    %c0_i32 = arith.constant 0 : i32
    %c0_i32_0 = arith.constant 0 : i32
    %c0_i32_1 = arith.constant 0 : i32
    return %c0_i32, %c0_i32_0 : i32, i32
  }
  func.func @transform_3(%arg0: i32) -> (i32, i32) {
    %c0_i32 = arith.constant 0 : i32
    %c0_i32_0 = arith.constant 0 : i32
    %c0_i32_1 = arith.constant 0 : i32
    return %c0_i32, %c0_i32_0 : i32, i32
  }
  func.func @transform_4(%arg0: i32) -> (i32, i32) {
    %c0_i32 = arith.constant 0 : i32
    %c0_i32_0 = arith.constant 0 : i32
    %c0_i32_1 = arith.constant 0 : i32
    return %c0_i32, %c0_i32_0 : i32, i32
  }
  func.func @transform_5(%arg0: i32) -> (i32, i32) {
    %c0_i32 = arith.constant 0 : i32
    %c0_i32_0 = arith.constant 0 : i32
    %c0_i32_1 = arith.constant 0 : i32
    return %c0_i32, %c0_i32_0 : i32, i32
  }
  func.func @transform_6(%arg0: i32) -> (i32, i32, i32) {
    %c0_i32 = arith.constant 0 : i32
    %c0_i32_0 = arith.constant 0 : i32
    %c0_i32_1 = arith.constant 0 : i32
    return %arg0, %c0_i32, %c0_i32_0 : i32, i32, i32
  }
}

</mosaic_0001>

<bundles_post_ra>
// kernel: tpu_custom_call.1
= control target key start
LH: loop header
LB: loop body
LE: loop exit
PB: predicated region body
PF: predicated region fallthrough
CT: control target
= control target key end

     0   :  { %11 = vsyncpa [#allocation4], 0  ;;  %s4949_s0 = inlined_call_operand.vmem [shape: f32[2,8,1024], index: 0, kind: input, shape index: {}]   ;;  %s4950_s1 = inlined_call_operand.vmem [shape: bf16[1024,224], index: 1, kind: input, shape index: {}]   ;;  %s4951_s2 = inlined_call_operand.vmem [shape: bf16[1024,224], index: 2, kind: input, shape index: {}]   ;;  %s4952_s3 = inlined_call_operand.vmem [shape: f32[1,32], index: 3, kind: input, shape index: {}]   ;;  %s4953_s4 = inlined_call_operand.vmem [shape: f32[32,112], index: 4, kind: input, shape index: {}]   ;;  %s4954_s5 = inlined_call_operand.vmem [shape: f32[1,16], index: 5, kind: input, shape index: {}]   ;;  %s4955_s6 = inlined_call_operand.hbm [shape: f32[2,8,16], index: 6, kind: output, shape index: {}]  }
   0x1   :  { %13 = vsyncpa [#allocation4 + $0x1], 0  ;;  %s3505_s21 = smov 0   ;;  %s3507_s22 = smov 0  }
   0x2   :  { %s3509_s23 = smov 0   ;;  %s3511_s24 = smov 0  }
   0x3 LB: > { %s3526_s25 = sadd.s32 4294967295, %s3459_s24   ;;  %s2655_s26 = sadd.s32 4294967294, %s3459_s24   ;;  %s3459_s24 = sphi %s3511_s24, %s5130_s24   ;;  %s3455_s23 = sphi %s3509_s23, %s5129_s23   ;;  %s3451_s22 = sphi %s3507_s22, %s5128_s22   ;;  %s3447_s21 = sphi %s3505_s21, %s5127_s21  }
   0x4   : > { %s3530_s27 = sadd.s32 1, %s3459_s24   ;;  %s157_s28 = sadd.s32 1, %s3455_s23 }
   0x5   : > { %s154_s29 = ssub.s32 %s3459_s24, %s3530_s27  ;;  %p167_p0 = scmp.ne.s32.totalorder %s3455_s23, %s3451_s22 }
   0x6   : > { %p155_p1 = scmp.eq.s32.totalorder %s154_s29, 0  ;;  %p168_p2 = scmp.eq.s32.totalorder %s3526_s25, 1 }
   0x7   : > { %p173_p3 = scmp.ne.s32.totalorder %s3451_s22, %s3447_s21  ;;  %p174_p4 = scmp.eq.s32.totalorder %s2655_s26, 1 }
   0x8   : > { %s3541_s30 = scalar_select %p155_p1, %s3455_s23, %s157_s28  }
   0x9   : > { %p3543_p5 = por %p168_p2, %p167_p0  ;;  %p3547_p6 = por %p174_p4, %p173_p3 }
   0xa   : > { %p2658_p7 = scmp.ge.s32.totalorder %s3459_s24, 1  ;;  %p215_p8 = scmp.lt.s32.totalorder %s3459_s24, 3 }
   0xc   : > { %p216_p9 = pnand %p2658_p7, %p215_p8 }
   0xe   : > { %219 = sbr.rel (%p216_p9) target bundleno = 1092 (0x444), region = 44 }
  0x13   : > { %v2989_v0 = vld [vmem:[%s4950_s1 + $0x74] ss:$8 sps:$4 sm:$0xff]   ;;  %v2993_v2 = vld [vmem:[%s4950_s1 + $0x70] ss:$8 sps:$4 sm:$0xff]   ;;  %v2995_v4 = vld [vmem:[%s4950_s1 + $0x64] ss:$8 sps:$4 sm:$0xff]  }
  0x14   : > { %v2991_v1 = vld [vmem:[%s4950_s1 + $0x174] ss:$8 sps:$4 sm:$0xff]   ;;  %1063 = vmatprep.subr.bf16.mxu0 %v2989_v0  ;;  %v2994_v3 = vld [vmem:[%s4950_s1 + $0x170] ss:$8 sps:$4 sm:$0xff]   ;;  %v2997_v5 = vld [vmem:[%s4950_s1 + $0x164] ss:$8 sps:$4 sm:$0xff]  }
  0x15   : > { %1104 = vmatprep.subr.bf16.mxu1 %v2991_v1  ;;  %1064 = vmatpush1.bf16.msra.mxu0 %v2993_v2  ;;  %v2999_v6 = vld [vmem:[%s4950_s1 + $0x60] ss:$8 sps:$4 sm:$0xff]   ;;  %v3001_v8 = vld [vmem:[%s4950_s1 + $0x54] ss:$8 sps:$4 sm:$0xff]   ;;  %v3005_v10 = vld [vmem:[%s4950_s1 + $0x50] ss:$8 sps:$4 sm:$0xff]  }
  0x16   : > { %1105 = vmatpush1.bf16.msra.mxu1 %v2994_v3  ;;  %1065 = vmatprep.subr.bf16.mxu0 %v2995_v4  ;;  %v3000_v7 = vld [vmem:[%s4950_s1 + $0x160] ss:$8 sps:$4 sm:$0xff]   ;;  %v3003_v9 = vld [vmem:[%s4950_s1 + $0x154] ss:$8 sps:$4 sm:$0xff]   ;;  %v3006_v11 = vld [vmem:[%s4950_s1 + $0x150] ss:$8 sps:$4 sm:$0xff]  }
  0x17   : > { %1106 = vmatprep.subr.bf16.mxu1 %v2997_v5  ;;  %v3007_v12 = vld [vmem:[%s4950_s1 + $0x44] ss:$8 sps:$4 sm:$0xff]   ;;  %v3011_v14 = vld [vmem:[%s4950_s1 + $0x40] ss:$8 sps:$4 sm:$0xff]   ;;  %v3013_v16 = vld [vmem:[%s4950_s1 + $0x34] ss:$8 sps:$4 sm:$0xff]  }
  0x18   : > { %v3009_v13 = vld [vmem:[%s4950_s1 + $0x144] ss:$8 sps:$4 sm:$0xff]   ;;  %v3012_v15 = vld [vmem:[%s4950_s1 + $0x140] ss:$8 sps:$4 sm:$0xff]   ;;  %v3015_v17 = vld [vmem:[%s4950_s1 + $0x134] ss:$8 sps:$4 sm:$0xff]  }
  0x19   : > { %1066 = vmatpush1.bf16.msra.mxu0 %v2999_v6  ;;  %v3017_v18 = vld [vmem:[%s4950_s1 + $0x30] ss:$8 sps:$4 sm:$0xff]   ;;  %v3019_v20 = vld [vmem:[%s4950_s1 + $0x24] ss:$8 sps:$4 sm:$0xff]   ;;  %v3023_v22 = vld [vmem:[%s4950_s1 + $0x20] ss:$8 sps:$4 sm:$0xff]  }
  0x1a   : > { %1107 = vmatpush1.bf16.msra.mxu1 %v3000_v7  ;;  %1067 = vmatprep.subr.bf16.mxu0 %v3001_v8  ;;  %v3018_v19 = vld [vmem:[%s4950_s1 + $0x130] ss:$8 sps:$4 sm:$0xff]   ;;  %v3021_v21 = vld [vmem:[%s4950_s1 + $0x124] ss:$8 sps:$4 sm:$0xff]   ;;  %v3024_v23 = vld [vmem:[%s4950_s1 + $0x120] ss:$8 sps:$4 sm:$0xff]  }
  0x1b   : > { %1108 = vmatprep.subr.bf16.mxu1 %v3003_v9  ;;  %v3025_v24 = vld [vmem:[%s4950_s1 + $0x14] ss:$8 sps:$4 sm:$0xff]   ;;  %v3634_v26 = vld [vmem:[%s4950_s1 + $0x10] ss:$8 sps:$4 sm:$0xff]   ;;  %v3644_v28 = vld [vmem:[%s4950_s1 + $0x4] ss:$8 sps:$4 sm:$0xff]  }
  0x1c   : > { %v3027_v25 = vld [vmem:[%s4950_s1 + $0x114] ss:$8 sps:$4 sm:$0xff]   ;;  %v3639_v27 = vld [vmem:[%s4950_s1 + $0x110] ss:$8 sps:$4 sm:$0xff]   ;;  %v3649_v29 = vld [vmem:[%s4950_s1 + $0x104] ss:$8 sps:$4 sm:$0xff]  }
  0x1d   : > { %1068 = vmatpush1.bf16.msra.mxu0 %v3005_v10  ;;  %v3654_v30 = vld [vmem:[%s4950_s1] ss:$8 sps:$4 sm:$0xff]   ;;  %v3666_v32 = vld [vmem:[%s4950_s1 + $0xf4] ss:$8 sps:$4 sm:$0xff]   ;;  %p245_p10 = scmp.lt.s32.totalorder %s3526_s25, 1  ;;  %vm251_vm0 = vcmask 785408  }
  0x1e   : > { %1109 = vmatpush1.bf16.msra.mxu1 %v3006_v11  ;;  %1069 = vmatprep.subr.bf16.mxu0 %v3007_v12  ;;  %v3661_v31 = vld [vmem:[%s4950_s1 + $0x100] ss:$8 sps:$4 sm:$0xff]   ;;  %v3674_v33 = vld [vmem:[%s4950_s1 + $0x1f4] ss:$8 sps:$4 sm:$0xff]   ;;  %v3679_v34 = vld [vmem:[%s4950_s1 + $0xf0] ss:$8 sps:$4 sm:$0xff]  }
  0x1f   : > { %1110 = vmatprep.subr.bf16.mxu1 %v3009_v13  ;;  %v3684_v35 = vld [vmem:[%s4950_s1 + $0x1f0] ss:$8 sps:$4 sm:$0xff]   ;;  %v3691_v36 = vld [vmem:[%s4950_s1 + $0xe4] ss:$8 sps:$4 sm:$0xff]   ;;  %s246_s29 = scalar_select %p245_p10, %s3526_s25, 1  ;;  %vm2351_vm1 = vcmask 1045504  }
  0x20   : > { %v3699_v37 = vld [vmem:[%s4950_s1 + $0x1e4] ss:$8 sps:$4 sm:$0xff]   ;;  %v3704_v38 = vld [vmem:[%s4950_s1 + $0xe0] ss:$8 sps:$4 sm:$0xff]   ;;  %v3716_v40 = vld [vmem:[%s4950_s1 + $0xd4] ss:$8 sps:$4 sm:$0xff]  }
  0x21   : > { %1070 = vmatpush1.bf16.msra.mxu0 %v3011_v14  ;;  %v3711_v39 = vld [vmem:[%s4950_s1 + $0x1e0] ss:$8 sps:$4 sm:$0xff]   ;;  %s2925_s17 = sshll.u32 %s246_s29, 6  ;;  %v3723_v41 = vld [vmem:[%s4950_s1 + $0x1d4] ss:$8 sps:$4 sm:$0xff]   ;;  %s3462_s18 = smov 64  }
  0x22   : > { %1111 = vmatpush1.bf16.msra.mxu1 %v3012_v15  ;;  %1071 = vmatprep.subr.bf16.mxu0 %v3013_v16  ;;  %v3728_v42 = vld [vmem:[%s4950_s1 + $0xd0] ss:$8 sps:$4 sm:$0xff]   ;;  %s3738_s11 = scalar_lea.vmem %s4949_s0, %s2925_s17  ;;  %v3745_v44 = vld [vmem:[%s4950_s1 + $0xc4] ss:$8 sps:$4 sm:$0xff]   ;;  %v3758_v47 = vld [vmem:[%s4950_s1 + $0xc0] ss:$8 sps:$4 sm:$0xff]  }
  0x23   : > { %1112 = vmatprep.subr.bf16.mxu1 %v3015_v17  ;;  %v3733_v43 = vld [vmem:[%s4950_s1 + $0x1d0] ss:$8 sps:$4 sm:$0xff]   ;;  %v3752_v45 = vld [vmem:[%s4950_s1 + $0x1c4] ss:$8 sps:$4 sm:$0xff]   ;;  %v3763_v48 = vld [vmem:[%s4950_s1 + $0x1c0] ss:$8 sps:$4 sm:$0xff]  }
  0x24   : > { %v256_v46 = vld [vmem:[%s3738_s11 + $0x8] sm:$0xff]  ;;  %v258_v50 = vld [vmem:[%s3738_s11 + $0x18] sm:$0xff]  ;;  %v255_v60 = vld [vmem:[%s3738_s11] sm:$0xff]  ;;  %s3463_s19 = smov 96   ;;  %vm2335_vm2 = vcmask 1046528   ;;  %s3464_s9 = smov 32  }
  0x25   : > { %1072 = vmatpush1.bf16.msra.mxu0 %v3017_v18  ;;  %v3765_v49 = vpack.c.bf16 %v256_v46, %v256_v46  ;;  %v3773_v51 = vld [vmem:[%s4950_s1 + $0xb4] ss:$8 sps:$4 sm:$0xff]   ;;  %v3775_v52 = vpack.c.bf16 %v258_v50, %v258_v50  ;;  %v3788_v55 = vld [vmem:[%s4950_s1 + $0xb0] ss:$8 sps:$4 sm:$0xff]   ;;  %v3799_v58 = vld [vmem:[%s4950_s1 + $0xa4] ss:$8 sps:$4 sm:$0xff]   ;;  %v3822_v4 = vpack.c.bf16 %v255_v60, %v255_v60 }
  0x26   : > { %1113 = vmatpush1.bf16.msra.mxu1 %v3018_v19  ;;  %1073 = vmatprep.subr.bf16.mxu0 %v3019_v20  ;;  %v3782_v53 = vld [vmem:[%s4950_s1 + $0x1b4] ss:$8 sps:$4 sm:$0xff]   ;;  %v3793_v56 = vld [vmem:[%s4950_s1 + $0x1b0] ss:$8 sps:$4 sm:$0xff]   ;;  %v3810_v63 = vld [vmem:[%s4950_s1 + $0x1a4] ss:$8 sps:$4 sm:$0xff]  }
  0x27   : > { %1114 = vmatprep.subr.bf16.mxu1 %v3021_v21  ;;  %v272_v54 = vunpack.c.l.bf16 %v3765_v49  ;;  %v274_v57 = vunpack.c.l.bf16 %v3775_v52  ;;  %v257_v62 = vld [vmem:[%s3738_s11 + $0x10] sm:$0xff]  ;;  %v3815_v2 = vld [vmem:[%s4950_s1 + $0xa0] ss:$8 sps:$4 sm:$0xff]   ;;  %v271_v10 = vunpack.c.l.bf16 %v3822_v4  ;;  %v3857_v12 = vld [vmem:[%s4950_s1 + $0x84] ss:$8 sps:$4 sm:$0xff]   ;;  %vm2387_vm3 = vcmask 1042432  }
  0x28   : > { %v3820_v3 = vld [vmem:[%s4950_s1 + $0x1a0] ss:$8 sps:$4 sm:$0xff]   ;;  %v3824_v5 = vpack.c.bf16 %v257_v62, %v257_v62  ;;  %v3831_v6 = vld [vmem:[%s4950_s1 + $0x94] ss:$8 sps:$4 sm:$0xff]   ;;  %v3843_v8 = vld [vmem:[%s4950_s1 + $0x90] ss:$8 sps:$4 sm:$0xff]  }
  0x29   : > { %1074 = vmatpush1.bf16.msra.mxu0 %v3023_v22  ;;  %v280_v59 = vsub.f32 %v256_v46, %v272_v54  ;;  %v282_v61 = vsub.f32 %v258_v50, %v274_v57  ;;  %v3838_v7 = vld [vmem:[%s4950_s1 + $0x194] ss:$8 sps:$4 sm:$0xff]   ;;  %v3848_v9 = vld [vmem:[%s4950_s1 + $0x190] ss:$8 sps:$4 sm:$0xff]   ;;  %v3864_v13 = vld [vmem:[%s4950_s1 + $0x184] ss:$8 sps:$4 sm:$0xff]   ;;  %v279_v16 = vsub.f32 %v255_v60, %v271_v10 }
  0x2a   : > { %1115 = vmatpush1.bf16.msra.mxu1 %v3024_v23  ;;  %1075 = vmatprep.subr.bf16.mxu0 %v3025_v24  ;;  %v273_v11 = vunpack.c.l.bf16 %v3824_v5  ;;  %v3869_v14 = vld [vmem:[%s4950_s1 + $0x80] ss:$8 sps:$4 sm:$0xff]   ;;  %v3881_v18 = vld [vmem:[%s4950_s1 + $0x274] ss:$8 sps:$4 sm:$0xff]   ;;  %v3893_v22 = vld [vmem:[%s4950_s1 + $0x270] ss:$8 sps:$4 sm:$0xff]  }
  0x2b   : > { %1116 = vmatprep.subr.bf16.mxu1 %v3027_v25  ;;  %v288_v0 = vpack.c.bf16 %v280_v59, %v280_v59  ;;  %v290_v1 = vpack.c.bf16 %v282_v61, %v282_v61  ;;  %v3874_v15 = vld [vmem:[%s4950_s1 + $0x180] ss:$8 sps:$4 sm:$0xff]   ;;  %v3888_v19 = vld [vmem:[%s4950_s1 + $0x374] ss:$8 sps:$4 sm:$0xff]   ;;  %v287_v20 = vpack.c.bf16 %v279_v16, %v279_v16  ;;  %v3898_v23 = vld [vmem:[%s4950_s1 + $0x370] ss:$8 sps:$4 sm:$0xff]  }
  0x2c   : > { %v281_v17 = vsub.f32 %v257_v62, %v273_v11  ;;  %v3905_v24 = vld [vmem:[%s4950_s1 + $0x264] ss:$8 sps:$4 sm:$0xff]   ;;  %v3917_v46 = vld [vmem:[%s4950_s1 + $0x260] ss:$8 sps:$4 sm:$0xff]   ;;  %v3929_v54 = vld [vmem:[%s4950_s1 + $0x254] ss:$8 sps:$4 sm:$0xff]  }
  0x2d   : > { %1076 = vmatpush1.bf16.msra.mxu0 %v3634_v26  ;;  %1095 = vmatprep.mubr.bf16.mxu0 %v288_v0  ;;  %v3912_v25 = vld [vmem:[%s4950_s1 + $0x364] ss:$8 sps:$4 sm:$0xff]   ;;  %5018 = vst [vmem:[#allocation7_spill] sm:$0xff] %v3917_v46  ;;  %v3922_v50 = vld [vmem:[%s4950_s1 + $0x360] ss:$8 sps:$4 sm:$0xff]   ;;  %5020 = vst [vmem:[#allocation9_spill] sm:$0xff] %v3929_v54 }
  0x2e   : > { %1117 = vmatpush1.bf16.msra.mxu1 %v3639_v27  ;;  %1077 = vmatprep.subr.bf16.mxu0 %v3644_v28  ;;  %v289_v21 = vpack.c.bf16 %v281_v17, %v281_v17  ;;  %5017 = vst [vmem:[#allocation6_spill] sm:$0xff] %v3912_v25  ;;  %5019 = vst [vmem:[#allocation8_spill] sm:$0xff] %v3922_v50  ;;  %v3936_v57 = vld [vmem:[%s4950_s1 + $0x354] ss:$8 sps:$4 sm:$0xff]   ;;  %v3941_v59 = vld [vmem:[%s4950_s1 + $0x250] ss:$8 sps:$4 sm:$0xff]  }
  0x2f   : > { %1118 = vmatprep.subr.bf16.mxu1 %v3649_v29  ;;  %1136 = vmatprep.mubr.bf16.mxu1 %v290_v1  ;;  %5021 = vst [vmem:[#allocation10_spill] sm:$0xff] %v3936_v57  ;;  %5022 = vst [vmem:[#allocation11_spill] sm:$0xff] %v3941_v59  ;;  %v3946_v60 = vld [vmem:[%s4950_s1 + $0x350] ss:$8 sps:$4 sm:$0xff]   ;;  %v3953_v61 = vld [vmem:[%s4950_s1 + $0x244] ss:$8 sps:$4 sm:$0xff]  }
  0x30   : > { %5023 = vst [vmem:[#allocation12_spill] sm:$0xff] %v3946_v60  ;;  %5024 = vst [vmem:[#allocation13_spill] sm:$0xff] %v3953_v61  ;;  %v3960_v62 = vld [vmem:[%s4950_s1 + $0x344] ss:$8 sps:$4 sm:$0xff]   ;;  %v3965_v0 = vld [vmem:[%s4950_s1 + $0x240] ss:$8 sps:$4 sm:$0xff]  }
  0x31   : > { %1078 = vmatpush1.bf16.msra.mxu0 %v3654_v30  ;;  %5025 = vst [vmem:[#allocation14_spill] sm:$0xff] %v3960_v62  ;;  %5026 = vst [vmem:[#allocation15_spill] sm:$0xff] %v3965_v0  ;;  %v3970_v1 = vld [vmem:[%s4950_s1 + $0x340] ss:$8 sps:$4 sm:$0xff]   ;;  %v3977_v10 = vld [vmem:[%s4950_s1 + $0x234] ss:$8 sps:$4 sm:$0xff]  }
  0x32   : > { %1119 = vmatpush1.bf16.msra.mxu1 %v3661_v31  ;;  %1079 = vmatprep.subr.bf16.mxu0 %v3666_v32  ;;  %5027 = vst [vmem:[#allocation16_spill] sm:$0xff] %v3970_v1  ;;  %5028 = vst [vmem:[#allocation17_spill] sm:$0xff] %v3977_v10  ;;  %v3984_v11 = vld [vmem:[%s4950_s1 + $0x334] ss:$8 sps:$4 sm:$0xff]   ;;  %v3989_v16 = vld [vmem:[%s4950_s1 + $0x230] ss:$8 sps:$4 sm:$0xff]  }
  0x33   : > { %1120 = vmatprep.subr.bf16.mxu1 %v3674_v33  ;;  %5029 = vst [vmem:[#allocation18_spill] sm:$0xff] %v3984_v11  ;;  %5030 = vst [vmem:[#allocation19_spill] sm:$0xff] %v3989_v16  ;;  %v3994_v17 = vld [vmem:[%s4950_s1 + $0x330] ss:$8 sps:$4 sm:$0xff]   ;;  %vm3465_vm4 = vmmov 0   ;;  %vm2403_vm5 = vcmask 1041408  }
  0x34   : > { %5031 = vst [vmem:[#allocation20_spill] sm:$0xff] %v3994_v17  ;;  %vm2375_vm6 = vcmask 1043456   ;;  %vm2435_vm7 = vcmask 261120   ;;  %s3466_s16 = smov 112   ;;  %s3467_s17 = smov 80   ;;  %vm2580_vm14 = vcmask 130048  }
  0x35   : > { %1080 = vmatpush2.bf16.msra.mxu0 %v3679_v34  ;;  %s3468_s20 = smov 48   ;;  %s2922_s28 = sshll.u32 %s3526_s25, 7 }
  0x36   : > { %1121 = vmatpush2.bf16.msra.mxu1 %v3684_v35  ;;  %1081 = vmatprep.subr.bf16.mxu0 %v3691_v36  ;;  %s2594_s13 = scalar_lea.hbm %s4955_s6, %s2922_s28 }
  0x37   : > { %1122 = vmatprep.subr.bf16.mxu1 %v3699_v37 }
  0x39   : > { %1082 = vmatpush2.bf16.msra.mxu0 %v3704_v38 }
  0x3a   : > { %1123 = vmatpush2.bf16.msra.mxu1 %v3711_v39  ;;  %1083 = vmatprep.subr.bf16.mxu0 %v3716_v40 }
  0x3b   : > { %1124 = vmatprep.subr.bf16.mxu1 %v3723_v41 }
  0x3d   : > { %1084 = vmatpush2.bf16.msra.mxu0 %v3728_v42 }
  0x3e   : > { %1125 = vmatpush2.bf16.msra.mxu1 %v3733_v43  ;;  %1085 = vmatprep.subr.bf16.mxu0 %v3745_v44 }
  0x3f   : > { %1126 = vmatprep.subr.bf16.mxu1 %v3752_v45 }
  0x41   : > { %1086 = vmatpush2.bf16.msra.mxu0 %v3758_v47 }
  0x42   : > { %1127 = vmatpush2.bf16.msra.mxu1 %v3763_v48  ;;  %1087 = vmatprep.subr.bf16.mxu0 %v3773_v51 }
  0x43   : > { %1128 = vmatprep.subr.bf16.mxu1 %v3782_v53 }
  0x45   : > { %1088 = vmatpush2.bf16.msra.mxu0 %v3788_v55 }
  0x46   : > { %1129 = vmatpush2.bf16.msra.mxu1 %v3793_v56  ;;  %1089 = vmatprep.subr.bf16.mxu0 %v3799_v58 }
  0x47   : > { %1130 = vmatprep.subr.bf16.mxu1 %v3810_v63 }
  0x49   : > { %1090 = vmatpush2.bf16.msra.mxu0 %v3815_v2 }
  0x4a   : > { %1131 = vmatpush2.bf16.msra.mxu1 %v3820_v3  ;;  %1091 = vmatprep.subr.bf16.mxu0 %v3831_v6 }
  0x4b   : > { %1132 = vmatprep.subr.bf16.mxu1 %v3838_v7 }
  0x4d   : > { %1092 = vmatpush2.bf16.msra.mxu0 %v3843_v8 }
  0x4e   : > { %1133 = vmatpush2.bf16.msra.mxu1 %v3848_v9  ;;  %1093 = vmatprep.subr.bf16.mxu0 %v3857_v12 }
  0x4f   : > { %1134 = vmatprep.subr.bf16.mxu1 %v3864_v13 }
  0x51   : > { %1094 = vmatpush2.bf16.msra.mxu0 %v3869_v14 }
  0x52   : > { %1135 = vmatpush2.bf16.msra.mxu1 %v3874_v15  ;;  %1145 = vmatprep.subr.bf16.mxu0 %v3881_v18 }
  0x53   : > { %1186 = vmatprep.subr.bf16.mxu1 %v3888_v19 }
  0x54   : > { %1096 = vmatmul.mubr.bf16.vlgmr.msra.gmra.mxu0 %v287_v20  ;;  %v4001_v20 = vld [vmem:[%s4950_s1 + $0x224] ss:$8 sps:$4 sm:$0xff]  }
  0x55   : > { %1137 = vmatmul.mubr.bf16.vlgmr.msra.gmra.mxu1 %v289_v21  ;;  %1146 = vmatpush1.bf16.msra.mxu0 %v3893_v22  ;;  %5032 = vst [vmem:[#allocation21_spill] sm:$0xff] %v4001_v20  ;;  %v4008_v21 = vld [vmem:[%s4950_s1 + $0x324] ss:$8 sps:$4 sm:$0xff]  }
  0x56   : > { %1187 = vmatpush1.bf16.msra.mxu1 %v3898_v23  ;;  %1147 = vmatprep.subr.bf16.mxu0 %v3905_v24  ;;  %5033 = vst [vmem:[#allocation22_spill] sm:$0xff] %v4008_v21 }
  0x57   : > { %1188 = vmatprep.subr.bf16.mxu1 %v3912_v25  ;;  %v4098_v25 = vld [vmem:[%s4950_s1 + $0x3f0] ss:$8 sps:$4 sm:$0xff]  }
  0x58   : > { %5048 = vst [vmem:[#allocation37_spill] sm:$0xff] %v4098_v25 }
  0x59   : > { %1148 = vmatpush1.bf16.msra.mxu0 %v3917_v46 }
  0x5a   : > { %1189 = vmatpush1.bf16.msra.mxu1 %v3922_v50  ;;  %1149 = vmatprep.subr.bf16.mxu0 %v3929_v54  ;;  %v4068_v54 = vld [vmem:[%s4950_s1 + $0x200] ss:$8 sps:$4 sm:$0xff]  }
  0x5b   : > { %1190 = vmatprep.subr.bf16.mxu1 %v3936_v57  ;;  %5043 = vst [vmem:[#allocation32_spill] sm:$0xff] %v4068_v54  ;;  %v4073_v50 = vld [vmem:[%s4950_s1 + $0x300] ss:$8 sps:$4 sm:$0xff]  }
  0x5c   : > { %5044 = vst [vmem:[#allocation33_spill] sm:$0xff] %v4073_v50 }
  0x5d   : > { %1150 = vmatpush1.bf16.msra.mxu0 %v3941_v59 }
  0x5e   : > { %1191 = vmatpush1.bf16.msra.mxu1 %v3946_v60  ;;  %1151 = vmatprep.subr.bf16.mxu0 %v3953_v61  ;;  %v262_v60 = vld [vmem:[%s3738_s11 + $0x38] sm:$0xff] }
  0x5f   : > { %1192 = vmatprep.subr.bf16.mxu1 %v3960_v62  ;;  %v260_v62 = vld [vmem:[%s3738_s11 + $0x28] sm:$0xff]  ;;  %v4060_v59 = vpack.c.bf16 %v262_v60, %v262_v60 }
  0x60   : > { %v4055_v61 = vpack.c.bf16 %v260_v62, %v260_v62 }
  0x61   : > { %1152 = vmatpush1.bf16.msra.mxu0 %v3965_v0  ;;  %v4013_v0 = vld [vmem:[%s4950_s1 + $0x220] ss:$8 sps:$4 sm:$0xff]   ;;  %5042 = vst [vmem:[#allocation31_spill] sm:$0xff] %v4060_v59 }
  0x62   : > { %1193 = vmatpush1.bf16.msra.mxu1 %v3970_v1  ;;  %1153 = vmatprep.subr.bf16.mxu0 %v3977_v10  ;;  %5034 = vst [vmem:[#allocation23_spill] sm:$0xff] %v4013_v0  ;;  %v4018_v1 = vld [vmem:[%s4950_s1 + $0x320] ss:$8 sps:$4 sm:$0xff]   ;;  %v4032_v10 = vld [vmem:[%s4950_s1 + $0x314] ss:$8 sps:$4 sm:$0xff]   ;;  %5041 = vst [vmem:[#allocation30_spill] sm:$0xff] %v4055_v61  ;;  %v276_v57 = vunpack.c.l.bf16 %v4055_v61 }
  0x63   : > { %1194 = vmatprep.subr.bf16.mxu1 %v3984_v11  ;;  %5035 = vst [vmem:[#allocation24_spill] sm:$0xff] %v4018_v1  ;;  %v4025_v11 = vld [vmem:[%s4950_s1 + $0x214] ss:$8 sps:$4 sm:$0xff]   ;;  %5037 = vst [vmem:[#allocation26_spill] sm:$0xff] %v4032_v10  ;;  %v4093_v61 = vld [vmem:[%s4950_s1 + $0x2f0] ss:$8 sps:$4 sm:$0xff]  }
  0x64   : > { %5036 = vst [vmem:[#allocation25_spill] sm:$0xff] %v4025_v11  ;;  %5047 = vst [vmem:[#allocation36_spill] sm:$0xff] %v4093_v61 }
  0x65   : > { %1154 = vmatpush1.bf16.msra.mxu0 %v3989_v16  ;;  %v4037_v16 = vld [vmem:[%s4950_s1 + $0x210] ss:$8 sps:$4 sm:$0xff]  }
  0x66   : > { %1195 = vmatpush1.bf16.msra.mxu1 %v3994_v17  ;;  %1155 = vmatprep.subr.bf16.mxu0 %v4001_v20  ;;  %v4042_v17 = vld [vmem:[%s4950_s1 + $0x310] ss:$8 sps:$4 sm:$0xff]   ;;  %v4053_v20 = vld [vmem:[%s4950_s1 + $0x304] ss:$8 sps:$4 sm:$0xff]  }
  0x67   : > { %1196 = vmatprep.subr.bf16.mxu1 %v4008_v21  ;;  %5038 = vst [vmem:[#allocation27_spill] sm:$0xff] %v4042_v17  ;;  %v4048_v21 = vld [vmem:[%s4950_s1 + $0x204] ss:$8 sps:$4 sm:$0xff]   ;;  %5040 = vst [vmem:[#allocation29_spill] sm:$0xff] %v4053_v20 }
  0x68   : > { %5039 = vst [vmem:[#allocation28_spill] sm:$0xff] %v4048_v21 }
  0x69   : > { %1156 = vmatpush1.bf16.msra.mxu0 %v4013_v0  ;;  %v284_v0 = vsub.f32 %v260_v62, %v276_v57  ;;  %v4108_v62 = vld [vmem:[%s4950_s1 + $0x3e4] ss:$8 sps:$4 sm:$0xff]  }
  0x6a   : > { %1197 = vmatpush1.bf16.msra.mxu1 %v4018_v1  ;;  %1157 = vmatprep.subr.bf16.mxu0 %v4025_v11  ;;  %v278_v1 = vunpack.c.l.bf16 %v4060_v59  ;;  %v4079_v11 = vld [vmem:[%s4950_s1 + $0x2f4] ss:$8 sps:$4 sm:$0xff]   ;;  %5050 = vst [vmem:[#allocation39_spill] sm:$0xff] %v4108_v62 }
  0x6b   : > { %1198 = vmatprep.subr.bf16.mxu1 %v4032_v10  ;;  %5045 = vst [vmem:[#allocation34_spill] sm:$0xff] %v4079_v11  ;;  %v4084_v10 = vld [vmem:[%s4950_s1 + $0x3f4] ss:$8 sps:$4 sm:$0xff]   ;;  %v292_v59 = vpack.c.bf16 %v284_v0, %v284_v0  ;;  %v4122_v0 = vld [vmem:[%s4950_s1 + $0x3e0] ss:$8 sps:$4 sm:$0xff]  }
  0x6c   : > { %5046 = vst [vmem:[#allocation35_spill] sm:$0xff] %v4084_v10  ;;  %v286_v46 = vsub.f32 %v262_v60, %v278_v1  ;;  %v4103_v60 = vld [vmem:[%s4950_s1 + $0x2e4] ss:$8 sps:$4 sm:$0xff]   ;;  %5052 = vst [vmem:[#allocation41_spill] sm:$0xff] %v4122_v0  ;;  %v4132_v1 = vld [vmem:[%s4950_s1 + $0x3d4] ss:$8 sps:$4 sm:$0xff]  }
  0x6d   : > { %1158 = vmatpush1.bf16.msra.mxu0 %v4037_v16  ;;  %5049 = vst [vmem:[#allocation38_spill] sm:$0xff] %v4103_v60  ;;  %1177 = vmatprep.mubr.bf16.mxu0 %v292_v59  ;;  %v4127_v59 = vld [vmem:[%s4950_s1 + $0x2d4] ss:$8 sps:$4 sm:$0xff]   ;;  %5054 = vst [vmem:[#allocation43_spill] sm:$0xff] %v4132_v1 }
  0x6e   : > { %1199 = vmatpush1.bf16.msra.mxu1 %v4042_v17  ;;  %1159 = vmatprep.subr.bf16.mxu0 %v4048_v21  ;;  %v294_v57 = vpack.c.bf16 %v286_v46, %v286_v46  ;;  %v4117_v46 = vld [vmem:[%s4950_s1 + $0x2e0] ss:$8 sps:$4 sm:$0xff]   ;;  %5053 = vst [vmem:[#allocation42_spill] sm:$0xff] %v4127_v59 }
  0x6f   : > { %1200 = vmatprep.subr.bf16.mxu1 %v4053_v20  ;;  %5051 = vst [vmem:[#allocation40_spill] sm:$0xff] %v4117_v46  ;;  %v4248_v20 = vld [vmem:[%s4950_s1 + $0x390] ss:$8 sps:$4 sm:$0xff]   ;;  %v4269_v21 = vld [vmem:[%s4950_s1 + $0x280] ss:$8 sps:$4 sm:$0xff]  }
  0x70   : > { %1218 = vmatprep.mubr.bf16.mxu1 %v294_v57  ;;  %v4141_v57 = vld [vmem:[%s4950_s1 + $0x2d0] ss:$8 sps:$4 sm:$0xff]   ;;  %v4274_v17 = vld [vmem:[%s4950_s1 + $0x380] ss:$8 sps:$4 sm:$0xff]  }
  0x71   : > { %1160 = vmatpush1.bf16.msra.mxu0 %v4068_v54  ;;  %5055 = vst [vmem:[#allocation44_spill] sm:$0xff] %v4141_v57  ;;  %v4243_v54 = vld [vmem:[%s4950_s1 + $0x290] ss:$8 sps:$4 sm:$0xff]  }
  0x72   : > { %1201 = vmatpush1.bf16.msra.mxu1 %v4073_v50  ;;  %1161 = vmatprep.subr.bf16.mxu0 %v4079_v11  ;;  %v259_v11 = vld [vmem:[%s3738_s11 + $0x20] sm:$0xff]  ;;  %v261_v50 = vld [vmem:[%s3738_s11 + $0x30] sm:$0xff] }
  0x73   : > { %1202 = vmatprep.subr.bf16.mxu1 %v4084_v10  ;;  %v4146_v10 = vld [vmem:[%s4950_s1 + $0x3d0] ss:$8 sps:$4 sm:$0xff]  }
  0x74   : > { %5056 = vst [vmem:[#allocation45_spill] sm:$0xff] %v4146_v10 }
  0x75   : > { %1162 = vmatpush2.bf16.msra.mxu0 %v4093_v61  ;;  %v4151_v61 = vld [vmem:[%s4950_s1 + $0x2c4] ss:$8 sps:$4 sm:$0xff]  }
  0x76   : > { %1203 = vmatpush2.bf16.msra.mxu1 %v4098_v25  ;;  %1163 = vmatprep.subr.bf16.mxu0 %v4103_v60  ;;  %5057 = vst [vmem:[#allocation46_spill] sm:$0xff] %v4151_v61  ;;  %v4165_v60 = vld [vmem:[%s4950_s1 + $0x2c0] ss:$8 sps:$4 sm:$0xff]  }
  0x77   : > { %1204 = vmatprep.subr.bf16.mxu1 %v4108_v62  ;;  %v4156_v62 = vld [vmem:[%s4950_s1 + $0x3c4] ss:$8 sps:$4 sm:$0xff]   ;;  %5059 = vst [vmem:[#allocation48_spill] sm:$0xff] %v4165_v60  ;;  %v4170_v25 = vld [vmem:[%s4950_s1 + $0x3c0] ss:$8 sps:$4 sm:$0xff]  }
  0x78   : > { %5058 = vst [vmem:[#allocation47_spill] sm:$0xff] %v4156_v62  ;;  %5060 = vst [vmem:[#allocation49_spill] sm:$0xff] %v4170_v25 }
  0x79   : > { %1164 = vmatpush2.bf16.msra.mxu0 %v4117_v46  ;;  %v4175_v46 = vld [vmem:[%s4950_s1 + $0x2b4] ss:$8 sps:$4 sm:$0xff]  }
  0x7a   : > { %1205 = vmatpush2.bf16.msra.mxu1 %v4122_v0  ;;  %1165 = vmatprep.subr.bf16.mxu0 %v4127_v59  ;;  %5061 = vst [vmem:[#allocation50_spill] sm:$0xff] %v4175_v46  ;;  %v4180_v59 = vld [vmem:[%s4950_s1 + $0x3b4] ss:$8 sps:$4 sm:$0xff]   ;;  %v4194_v0 = vld [vmem:[%s4950_s1 + $0x3b0] ss:$8 sps:$4 sm:$0xff]  }
  0x7b   : > { %1206 = vmatprep.subr.bf16.mxu1 %v4132_v1  ;;  %5062 = vst [vmem:[#allocation51_spill] sm:$0xff] %v4180_v59  ;;  %v4189_v1 = vld [vmem:[%s4950_s1 + $0x2b0] ss:$8 sps:$4 sm:$0xff]   ;;  %5064 = vst [vmem:[#allocation53_spill] sm:$0xff] %v4194_v0 }
  0x7c   : > { %5063 = vst [vmem:[#allocation52_spill] sm:$0xff] %v4189_v1 }
  0x7d   : > { %1166 = vmatpush2.bf16.msra.mxu0 %v4141_v57  ;;  %v4220_v57 = vld [vmem:[%s4950_s1 + $0x3a0] ss:$8 sps:$4 sm:$0xff]  }
  0x7e   : > { %1207 = vmatpush2.bf16.msra.mxu1 %v4146_v10  ;;  %1167 = vmatprep.subr.bf16.mxu0 %v4151_v61  ;;  %v4201_v10 = vld [vmem:[%s4950_s1 + $0x2a4] ss:$8 sps:$4 sm:$0xff]   ;;  %v4215_v61 = vld [vmem:[%s4950_s1 + $0x2a0] ss:$8 sps:$4 sm:$0xff]   ;;  %5067 = vst [vmem:[#allocation56_spill] sm:$0xff] %v4220_v57 }
  0x7f   : > { %1208 = vmatprep.subr.bf16.mxu1 %v4156_v62  ;;  %5065 = vst [vmem:[#allocation54_spill] sm:$0xff] %v4201_v10  ;;  %v4206_v62 = vld [vmem:[%s4950_s1 + $0x3a4] ss:$8 sps:$4 sm:$0xff]  }
  0x80   : > { %5066 = vst [vmem:[#allocation55_spill] sm:$0xff] %v4206_v62 }
  0x81   : > { %1168 = vmatpush2.bf16.msra.mxu0 %v4165_v60  ;;  %v4225_v60 = vld [vmem:[%s4950_s1 + $0x294] ss:$8 sps:$4 sm:$0xff]  }
  0x82   : > { %1209 = vmatpush2.bf16.msra.mxu1 %v4170_v25  ;;  %1169 = vmatprep.subr.bf16.mxu0 %v4175_v46  ;;  %5068 = vst [vmem:[#allocation57_spill] sm:$0xff] %v4225_v60  ;;  %v4230_v46 = vld [vmem:[%s4950_s1 + $0x394] ss:$8 sps:$4 sm:$0xff]   ;;  %v4234_v25 = vpack.c.bf16 %v261_v50, %v261_v50 }
  0x83   : > { %1210 = vmatprep.subr.bf16.mxu1 %v4180_v59  ;;  %5069 = vst [vmem:[#allocation58_spill] sm:$0xff] %v4230_v46  ;;  %v4232_v59 = vpack.c.bf16 %v259_v11, %v259_v11 }
  0x84   : > { %5071 = vst [vmem:[#allocation60_spill] sm:$0xff] %v4234_v25 }
  0x85   : > { %5070 = vst [vmem:[#allocation59_spill] sm:$0xff] %v4232_v59  ;;  %1170 = vmatpush2.bf16.msra.mxu0 %v4189_v1  ;;  %v4253_v1 = vld [vmem:[%s4950_s1 + $0x284] ss:$8 sps:$4 sm:$0xff]  }
  0x86   : > { %1211 = vmatpush2.bf16.msra.mxu1 %v4194_v0  ;;  %1171 = vmatprep.subr.bf16.mxu0 %v4201_v10  ;;  %v4258_v10 = vld [vmem:[%s4950_s1 + $0x384] ss:$8 sps:$4 sm:$0xff]   ;;  %v277_v0 = vunpack.c.l.bf16 %v4234_v25 }
  0x87   : > { %1212 = vmatprep.subr.bf16.mxu1 %v4206_v62  ;;  %v275_v62 = vunpack.c.l.bf16 %v4232_v59 }
  0x88   : > { %v285_v25 = vsub.f32 %v261_v50, %v277_v0  ;;  %v3374_v50 = vld [vmem:[%s4950_s1 + $0x174] ss:$8 sps:$4 sm:$0xff]   ;;  %v3380_v0 = vld [vmem:[%s4950_s1 + $0x160] ss:$8 sps:$4 sm:$0xff]  }
  0x89   : > { %1172 = vmatpush2.bf16.msra.mxu0 %v4215_v61  ;;  %v283_v59 = vsub.f32 %v259_v11, %v275_v62  ;;  %v3376_v11 = vld [vmem:[%s4950_s1 + $0x170] ss:$8 sps:$4 sm:$0xff]   ;;  %v3377_v62 = vld [vmem:[%s4950_s1 + $0x64] ss:$8 sps:$4 sm:$0xff]  }
  0x8a   : > { %1213 = vmatpush2.bf16.msra.mxu1 %v4220_v57  ;;  %1173 = vmatprep.subr.bf16.mxu0 %v4225_v60  ;;  %v293_v60 = vpack.c.bf16 %v285_v25, %v285_v25  ;;  %v3373_v57 = vld [vmem:[%s4950_s1 + $0x74] ss:$8 sps:$4 sm:$0xff]   ;;  %v3375_v25 = vld [vmem:[%s4950_s1 + $0x70] ss:$8 sps:$4 sm:$0xff]  }
  0x8b   : > { %1214 = vmatprep.subr.bf16.mxu1 %v4230_v46  ;;  %v291_v46 = vpack.c.bf16 %v283_v59, %v283_v59  ;;  %v3381_v59 = vld [vmem:[%s4950_s1 + $0x54] ss:$8 sps:$4 sm:$0xff]  }
  0x8d   : > { %1174 = vmatpush2.bf16.msra.mxu0 %v4243_v54 }
  0x8e   : > { %1215 = vmatpush2.bf16.msra.mxu1 %v4248_v20  ;;  %1175 = vmatprep.subr.bf16.mxu0 %v4253_v1 }
  0x8f   : > { %1216 = vmatprep.subr.bf16.mxu1 %v4258_v10 }
  0x91   : > { %1176 = vmatpush2.bf16.msra.mxu0 %v4269_v21 }
  0x92   : > { %1217 = vmatpush2.bf16.msra.mxu1 %v4274_v17  ;;  %1227 = vmatprep.subr.bf16.mxu0 %v3373_v57  ;;  %v3382_v57 = vld [vmem:[%s4950_s1 + $0x154] ss:$8 sps:$4 sm:$0xff]  }
  0x93   : > { %1268 = vmatprep.subr.bf16.mxu1 %v3374_v50  ;;  %v3383_v50 = vld [vmem:[%s4950_s1 + $0x50] ss:$8 sps:$4 sm:$0xff]  }
  0x94   : > { %1178 = vmatmul.mubr.bf16.vlgmr.msra.gmra.mxu0 %v291_v46  ;;  %v3378_v46 = vld [vmem:[%s4950_s1 + $0x164] ss:$8 sps:$4 sm:$0xff]  }
  0x95   : > { %1219 = vmatmul.mubr.bf16.vlgmr.msra.gmra.mxu1 %v293_v60  ;;  %1228 = vmatpush1.bf16.msra.mxu0 %v3375_v25  ;;  %v3379_v60 = vld [vmem:[%s4950_s1 + $0x60] ss:$8 sps:$4 sm:$0xff]   ;;  %v3384_v25 = vld [vmem:[%s4950_s1 + $0x150] ss:$8 sps:$4 sm:$0xff]  }
  0x96   : > { %1269 = vmatpush1.bf16.msra.mxu1 %v3376_v11  ;;  %1229 = vmatprep.subr.bf16.mxu0 %v3377_v62  ;;  %v3385_v11 = vld [vmem:[%s4950_s1 + $0x44] ss:$8 sps:$4 sm:$0xff]  }
  0x97   : > { %1270 = vmatprep.subr.bf16.mxu1 %v3378_v46  ;;  %1259 = vmatprep.mubr.bf16.mxu0 %v3765_v49  ;;  %v3386_v62 = vld [vmem:[%s4950_s1 + $0x144] ss:$8 sps:$4 sm:$0xff]   ;;  %v3387_v46 = vld [vmem:[%s4950_s1 + $0x40] ss:$8 sps:$4 sm:$0xff]  }
  0x98   : > { %1300 = vmatprep.mubr.bf16.mxu1 %v3775_v52 }
  0x99   : > { %1230 = vmatpush1.bf16.msra.mxu0 %v3379_v60  ;;  %v3388_v60 = vld [vmem:[%s4950_s1 + $0x140] ss:$8 sps:$4 sm:$0xff]  }
  0x9a   : > { %1271 = vmatpush1.bf16.msra.mxu1 %v3380_v0  ;;  %1231 = vmatprep.subr.bf16.mxu0 %v3381_v59  ;;  %v3389_v0 = vld [vmem:[%s4950_s1 + $0x34] ss:$8 sps:$4 sm:$0xff]  }
  0x9b   : > { %1272 = vmatprep.subr.bf16.mxu1 %v3382_v57  ;;  %v3390_v59 = vld [vmem:[%s4950_s1 + $0x134] ss:$8 sps:$4 sm:$0xff]   ;;  %v3391_v57 = vld [vmem:[%s4950_s1 + $0x30] ss:$8 sps:$4 sm:$0xff]  }
  0x9d   : > { %1232 = vmatpush1.bf16.msra.mxu0 %v3383_v50  ;;  %v3392_v50 = vld [vmem:[%s4950_s1 + $0x130] ss:$8 sps:$4 sm:$0xff]  }
  0x9e   : > { %1273 = vmatpush1.bf16.msra.mxu1 %v3384_v25  ;;  %1233 = vmatprep.subr.bf16.mxu0 %v3385_v11  ;;  %v3393_v25 = vld [vmem:[%s4950_s1 + $0x24] ss:$8 sps:$4 sm:$0xff]  }
  0x9f   : > { %1274 = vmatprep.subr.bf16.mxu1 %v3386_v62  ;;  %v3394_v11 = vld [vmem:[%s4950_s1 + $0x124] ss:$8 sps:$4 sm:$0xff]   ;;  %v3395_v62 = vld [vmem:[%s4950_s1 + $0x20] ss:$8 sps:$4 sm:$0xff]  }
  0xa1   : > { %1234 = vmatpush1.bf16.msra.mxu0 %v3387_v46  ;;  %v3396_v46 = vld [vmem:[%s4950_s1 + $0x120] ss:$8 sps:$4 sm:$0xff]  }
  0xa2   : > { %1275 = vmatpush1.bf16.msra.mxu1 %v3388_v60  ;;  %1235 = vmatprep.subr.bf16.mxu0 %v3389_v0  ;;  %v3397_v60 = vld [vmem:[%s4950_s1 + $0x14] ss:$8 sps:$4 sm:$0xff]  }
  0xa3   : > { %1276 = vmatprep.subr.bf16.mxu1 %v3390_v59  ;;  %v3398_v0 = vld [vmem:[%s4950_s1 + $0x114] ss:$8 sps:$4 sm:$0xff]   ;;  %v5116_v59 = vld [vmem:[#allocation50_spill] sm:$0xff] }
  0xa5   : > { %1236 = vmatpush1.bf16.msra.mxu0 %v3391_v57  ;;  %v5117_v57 = vld [vmem:[#allocation51_spill] sm:$0xff] }
  0xa6   : > { %1277 = vmatpush1.bf16.msra.mxu1 %v3392_v50  ;;  %1237 = vmatprep.subr.bf16.mxu0 %v3393_v25  ;;  %v5118_v50 = vld [vmem:[#allocation52_spill] sm:$0xff]  ;;  %v5119_v25 = vld [vmem:[#allocation53_spill] sm:$0xff] }
  0xa7   : > { %1278 = vmatprep.subr.bf16.mxu1 %v3394_v11  ;;  %v5120_v11 = vld [vmem:[#allocation54_spill] sm:$0xff] }
  0xa9   : > { %1238 = vmatpush1.bf16.msra.mxu0 %v3395_v62  ;;  %v5121_v62 = vld [vmem:[#allocation55_spill] sm:$0xff] }
  0xaa   : > { %1279 = vmatpush1.bf16.msra.mxu1 %v3396_v46  ;;  %1239 = vmatprep.subr.bf16.mxu0 %v3397_v60  ;;  %v5122_v46 = vld [vmem:[#allocation56_spill] sm:$0xff]  ;;  %v5123_v60 = vld [vmem:[#allocation57_spill] sm:$0xff] }
  0xab   : > { %1280 = vmatprep.subr.bf16.mxu1 %v3398_v0  ;;  %v5124_v0 = vld [vmem:[#allocation58_spill] sm:$0xff] }
  0xad   : > { %1240 = vmatpush1.bf16.msra.mxu0 %v3634_v26  ;;  %v5072_v26 = vld [vmem:[#allocation6_spill] sm:$0xff] }
  0xae   : > { %1281 = vmatpush1.bf16.msra.mxu1 %v3639_v27  ;;  %1241 = vmatprep.subr.bf16.mxu0 %v3644_v28  ;;  %v5073_v27 = vld [vmem:[#allocation30_spill] sm:$0xff]  ;;  %v5074_v28 = vld [vmem:[#allocation31_spill] sm:$0xff] }
  0xaf   : > { %1282 = vmatprep.subr.bf16.mxu1 %v3649_v29  ;;  %v5075_v29 = vld [vmem:[#allocation7_spill] sm:$0xff] }
  0xb1   : > { %1242 = vmatpush1.bf16.msra.mxu0 %v3654_v30  ;;  %v5076_v30 = vld [vmem:[#allocation8_spill] sm:$0xff] }
  0xb2   : > { %1283 = vmatpush1.bf16.msra.mxu1 %v3661_v31  ;;  %1243 = vmatprep.subr.bf16.mxu0 %v3666_v32  ;;  %v5077_v31 = vld [vmem:[#allocation9_spill] sm:$0xff]  ;;  %v5078_v32 = vld [vmem:[#allocation10_spill] sm:$0xff] }
  0xb3   : > { %1284 = vmatprep.subr.bf16.mxu1 %v3674_v33  ;;  %v5079_v33 = vld [vmem:[#allocation11_spill] sm:$0xff] }
  0xb5   : > { %1244 = vmatpush2.bf16.msra.mxu0 %v3679_v34  ;;  %v5080_v34 = vld [vmem:[#allocation12_spill] sm:$0xff] }
  0xb6   : > { %1285 = vmatpush2.bf16.msra.mxu1 %v3684_v35  ;;  %1245 = vmatprep.subr.bf16.mxu0 %v3691_v36  ;;  %v5081_v35 = vld [vmem:[#allocation13_spill] sm:$0xff]  ;;  %v5082_v36 = vld [vmem:[#allocation14_spill] sm:$0xff] }
  0xb7   : > { %1286 = vmatprep.subr.bf16.mxu1 %v3699_v37  ;;  %v5083_v37 = vld [vmem:[#allocation15_spill] sm:$0xff] }
  0xb9   : > { %1246 = vmatpush2.bf16.msra.mxu0 %v3704_v38  ;;  %v5084_v38 = vld [vmem:[#allocation16_spill] sm:$0xff] }
  0xba   : > { %1287 = vmatpush2.bf16.msra.mxu1 %v3711_v39  ;;  %1247 = vmatprep.subr.bf16.mxu0 %v3716_v40  ;;  %v5085_v39 = vld [vmem:[#allocation17_spill] sm:$0xff]  ;;  %v5086_v40 = vld [vmem:[#allocation18_spill] sm:$0xff] }
  0xbb   : > { %1288 = vmatprep.subr.bf16.mxu1 %v3723_v41  ;;  %v5087_v41 = vld [vmem:[#allocation19_spill] sm:$0xff] }
  0xbd   : > { %1248 = vmatpush2.bf16.msra.mxu0 %v3728_v42  ;;  %v5088_v42 = vld [vmem:[#allocation20_spill] sm:$0xff] }
  0xbe   : > { %1289 = vmatpush2.bf16.msra.mxu1 %v3733_v43  ;;  %1249 = vmatprep.subr.bf16.mxu0 %v3745_v44  ;;  %v5089_v43 = vld [vmem:[#allocation21_spill] sm:$0xff]  ;;  %v5090_v44 = vld [vmem:[#allocation22_spill] sm:$0xff] }
  0xbf   : > { %1290 = vmatprep.subr.bf16.mxu1 %v3752_v45  ;;  %v5091_v45 = vld [vmem:[#allocation23_spill] sm:$0xff] }
  0xc1   : > { %1250 = vmatpush2.bf16.msra.mxu0 %v3758_v47  ;;  %v5092_v47 = vld [vmem:[#allocation24_spill] sm:$0xff] }
  0xc2   : > { %1291 = vmatpush2.bf16.msra.mxu1 %v3763_v48  ;;  %1251 = vmatprep.subr.bf16.mxu0 %v3773_v51  ;;  %v5093_v48 = vld [vmem:[#allocation25_spill] sm:$0xff]  ;;  %v5094_v51 = vld [vmem:[#allocation26_spill] sm:$0xff] }
  0xc3   : > { %1292 = vmatprep.subr.bf16.mxu1 %v3782_v53  ;;  %v5095_v53 = vld [vmem:[#allocation27_spill] sm:$0xff] }
  0xc5   : > { %1252 = vmatpush2.bf16.msra.mxu0 %v3788_v55  ;;  %v5096_v55 = vld [vmem:[#allocation28_spill] sm:$0xff] }
  0xc6   : > { %1293 = vmatpush2.bf16.msra.mxu1 %v3793_v56  ;;  %1253 = vmatprep.subr.bf16.mxu0 %v3799_v58  ;;  %v5097_v56 = vld [vmem:[#allocation29_spill] sm:$0xff]  ;;  %v5098_v58 = vld [vmem:[#allocation32_spill] sm:$0xff] }
  0xc7   : > { %1294 = vmatprep.subr.bf16.mxu1 %v3810_v63  ;;  %v5099_v63 = vld [vmem:[#allocation33_spill] sm:$0xff] }
  0xc9   : > { %1254 = vmatpush2.bf16.msra.mxu0 %v3815_v2  ;;  %v5100_v2 = vld [vmem:[#allocation34_spill] sm:$0xff] }
  0xca   : > { %1295 = vmatpush2.bf16.msra.mxu1 %v3820_v3  ;;  %1255 = vmatprep.subr.bf16.mxu0 %v3831_v6  ;;  %v5101_v3 = vld [vmem:[#allocation35_spill] sm:$0xff]  ;;  %v5102_v6 = vld [vmem:[#allocation36_spill] sm:$0xff] }
  0xcb   : > { %1296 = vmatprep.subr.bf16.mxu1 %v3838_v7  ;;  %v5103_v7 = vld [vmem:[#allocation37_spill] sm:$0xff] }
  0xcd   : > { %1256 = vmatpush2.bf16.msra.mxu0 %v3843_v8  ;;  %v5104_v8 = vld [vmem:[#allocation38_spill] sm:$0xff] }
  0xce   : > { %1297 = vmatpush2.bf16.msra.mxu1 %v3848_v9  ;;  %1257 = vmatprep.subr.bf16.mxu0 %v3857_v12  ;;  %v5105_v9 = vld [vmem:[#allocation39_spill] sm:$0xff]  ;;  %v5106_v12 = vld [vmem:[#allocation40_spill] sm:$0xff] }
  0xcf   : > { %1298 = vmatprep.subr.bf16.mxu1 %v3864_v13  ;;  %v5107_v13 = vld [vmem:[#allocation41_spill] sm:$0xff] }
  0xd1   : > { %1258 = vmatpush2.bf16.msra.mxu0 %v3869_v14  ;;  %v5108_v14 = vld [vmem:[#allocation42_spill] sm:$0xff] }
  0xd2   : > { %1299 = vmatpush2.bf16.msra.mxu1 %v3874_v15  ;;  %1309 = vmatprep.subr.bf16.mxu0 %v3881_v18  ;;  %v5109_v15 = vld [vmem:[#allocation43_spill] sm:$0xff]  ;;  %v5110_v18 = vld [vmem:[#allocation44_spill] sm:$0xff] }
  0xd3   : > { %1350 = vmatprep.subr.bf16.mxu1 %v3888_v19  ;;  %v5111_v19 = vld [vmem:[#allocation45_spill] sm:$0xff] }
  0xd4   : > { %1260 = vmatmul.mubr.bf16.vlgmr.msra.gmra.mxu0 %v3822_v4 }
  0xd5   : > { %1301 = vmatmul.mubr.bf16.vlgmr.msra.gmra.mxu1 %v3824_v5  ;;  %1310 = vmatpush1.bf16.msra.mxu0 %v3893_v22  ;;  %v5112_v22 = vld [vmem:[#allocation46_spill] sm:$0xff] }
  0xd6   : > { %1351 = vmatpush1.bf16.msra.mxu1 %v3898_v23  ;;  %1311 = vmatprep.subr.bf16.mxu0 %v3905_v24  ;;  %v5113_v23 = vld [vmem:[#allocation47_spill] sm:$0xff]  ;;  %v5114_v24 = vld [vmem:[#allocation48_spill] sm:$0xff] }
  0xd7   : > { %1352 = vmatprep.subr.bf16.mxu1 %v5072_v26  ;;  %1341 = vmatprep.mubr.bf16.mxu0 %v5073_v27  ;;  %v3183_v26 = vld [vmem:[%s4951_s2 + $0x74] ss:$8 sps:$4 sm:$0xff]  }
  0xd8   : > { %1382 = vmatprep.mubr.bf16.mxu1 %v5074_v28 }
  0xd9   : > { %1312 = vmatpush1.bf16.msra.mxu0 %v5075_v29  ;;  %v5125_v29 = vld [vmem:[#allocation59_spill] sm:$0xff] }
  0xda   : > { %1353 = vmatpush1.bf16.msra.mxu1 %v5076_v30  ;;  %1313 = vmatprep.subr.bf16.mxu0 %v5077_v31  ;;  %v5126_v30 = vld [vmem:[#allocation60_spill] sm:$0xff] }
  0xdb   : > { %1354 = vmatprep.subr.bf16.mxu1 %v5078_v32  ;;  %v3187_v32 = vld [vmem:[%s4951_s2 + $0x60] ss:$8 sps:$4 sm:$0xff]  }
  0xdd   : > { %1314 = vmatpush1.bf16.msra.mxu0 %v5079_v33  ;;  %v3190_v33 = vld [vmem:[%s4951_s2 + $0x160] ss:$8 sps:$4 sm:$0xff]  }
  0xde   : > { %1355 = vmatpush1.bf16.msra.mxu1 %v5080_v34  ;;  %1315 = vmatprep.subr.bf16.mxu0 %v5081_v35 }
  0xdf   : > { %1356 = vmatprep.subr.bf16.mxu1 %v5082_v36  ;;  %v3195_v36 = vld [vmem:[%s4951_s2 + $0x54] ss:$8 sps:$4 sm:$0xff]  }
  0xe1   : > { %1316 = vmatpush1.bf16.msra.mxu0 %v5083_v37  ;;  %v3198_v37 = vld [vmem:[%s4951_s2 + $0x154] ss:$8 sps:$4 sm:$0xff]  }
  0xe2   : > { %1357 = vmatpush1.bf16.msra.mxu1 %v5084_v38  ;;  %1317 = vmatprep.subr.bf16.mxu0 %v5085_v39 }
  0xe3   : > { %1358 = vmatprep.subr.bf16.mxu1 %v5086_v40 }
  0xe5   : > { %1318 = vmatpush1.bf16.msra.mxu0 %v5087_v41  ;;  %v3193_v41 = vld [vmem:[%s4951_s2 + $0x50] ss:$8 sps:$4 sm:$0xff]  }
  0xe6   : > { %1359 = vmatpush1.bf16.msra.mxu1 %v5088_v42  ;;  %1319 = vmatprep.subr.bf16.mxu0 %v5089_v43  ;;  %v3196_v42 = vld [vmem:[%s4951_s2 + $0x150] ss:$8 sps:$4 sm:$0xff]  }
  0xe7   : > { %1360 = vmatprep.subr.bf16.mxu1 %v5090_v44 }
  0xe9   : > { %1320 = vmatpush1.bf16.msra.mxu0 %v5091_v45  ;;  %v3199_v45 = vld [vmem:[%s4951_s2 + $0x40] ss:$8 sps:$4 sm:$0xff]  }
  0xea   : > { %1361 = vmatpush1.bf16.msra.mxu1 %v5092_v47  ;;  %1321 = vmatprep.subr.bf16.mxu0 %v5093_v48  ;;  %v3202_v47 = vld [vmem:[%s4951_s2 + $0x140] ss:$8 sps:$4 sm:$0xff]   ;;  %v3207_v48 = vld [vmem:[%s4951_s2 + $0x34] ss:$8 sps:$4 sm:$0xff]  }
  0xeb   : > { %1362 = vmatprep.subr.bf16.mxu1 %v5094_v51  ;;  %v3210_v51 = vld [vmem:[%s4951_s2 + $0x134] ss:$8 sps:$4 sm:$0xff]  }
  0xed   : > { %1322 = vmatpush1.bf16.msra.mxu0 %v4037_v16  ;;  %v5115_v16 = vld [vmem:[#allocation49_spill] sm:$0xff] }
  0xee   : > { %1363 = vmatpush1.bf16.msra.mxu1 %v5095_v53  ;;  %1323 = vmatprep.subr.bf16.mxu0 %v5096_v55  ;;  %v3205_v53 = vld [vmem:[%s4951_s2 + $0x30] ss:$8 sps:$4 sm:$0xff]  }
  0xef   : > { %1364 = vmatprep.subr.bf16.mxu1 %v5097_v56  ;;  %v3208_v55 = vld [vmem:[%s4951_s2 + $0x130] ss:$8 sps:$4 sm:$0xff]   ;;  %v3213_v56 = vld [vmem:[%s4951_s2 + $0x24] ss:$8 sps:$4 sm:$0xff]  }
  0xf1   : > { %1324 = vmatpush1.bf16.msra.mxu0 %v5098_v58  ;;  %v3216_v58 = vld [vmem:[%s4951_s2 + $0x124] ss:$8 sps:$4 sm:$0xff]  }
  0xf2   : > { %1365 = vmatpush1.bf16.msra.mxu1 %v5099_v63  ;;  %1325 = vmatprep.subr.bf16.mxu0 %v5100_v2  ;;  %v3211_v63 = vld [vmem:[%s4951_s2 + $0x20] ss:$8 sps:$4 sm:$0xff]  }
  0xf3   : > { %1366 = vmatprep.subr.bf16.mxu1 %v5101_v3  ;;  %v3214_v2 = vld [vmem:[%s4951_s2 + $0x120] ss:$8 sps:$4 sm:$0xff]   ;;  %v3219_v3 = vld [vmem:[%s4951_s2 + $0x14] ss:$8 sps:$4 sm:$0xff]  }
  0xf5   : > { %1326 = vmatpush2.bf16.msra.mxu0 %v5102_v6  ;;  %v3222_v6 = vld [vmem:[%s4951_s2 + $0x114] ss:$8 sps:$4 sm:$0xff]  }
  0xf6   : > { %1367 = vmatpush2.bf16.msra.mxu1 %v5103_v7  ;;  %1327 = vmatprep.subr.bf16.mxu0 %v5104_v8  ;;  %v3217_v7 = vld [vmem:[%s4951_s2 + $0x10] ss:$8 sps:$4 sm:$0xff]  }
  0xf7   : > { %1368 = vmatprep.subr.bf16.mxu1 %v5105_v9  ;;  %v3220_v8 = vld [vmem:[%s4951_s2 + $0x110] ss:$8 sps:$4 sm:$0xff]   ;;  %v3225_v9 = vld [vmem:[%s4951_s2 + $0x4] ss:$8 sps:$4 sm:$0xff]  }
  0xf9   : > { %1328 = vmatpush2.bf16.msra.mxu0 %v5106_v12  ;;  %v3228_v12 = vld [vmem:[%s4951_s2 + $0x104] ss:$8 sps:$4 sm:$0xff]  }
  0xfa   : > { %1369 = vmatpush2.bf16.msra.mxu1 %v5107_v13  ;;  %1329 = vmatprep.subr.bf16.mxu0 %v5108_v14  ;;  %v3223_v13 = vld [vmem:[%s4951_s2] ss:$8 sps:$4 sm:$0xff]  }
  0xfb   : > { %1370 = vmatprep.subr.bf16.mxu1 %v5109_v15  ;;  %v3226_v14 = vld [vmem:[%s4951_s2 + $0x100] ss:$8 sps:$4 sm:$0xff]   ;;  %v3231_v15 = vld [vmem:[%s4951_s2 + $0xf4] ss:$8 sps:$4 sm:$0xff]  }
  0xfd   : > { %1330 = vmatpush2.bf16.msra.mxu0 %v5110_v18  ;;  %v3234_v18 = vld [vmem:[%s4951_s2 + $0x1f4] ss:$8 sps:$4 sm:$0xff]  }
  0xfe   : > { %1371 = vmatpush2.bf16.msra.mxu1 %v5111_v19  ;;  %1331 = vmatprep.subr.bf16.mxu0 %v5112_v22  ;;  %v3229_v19 = vld [vmem:[%s4951_s2 + $0xf0] ss:$8 sps:$4 sm:$0xff]  }
  0xff   : > { %1372 = vmatprep.subr.bf16.mxu1 %v5113_v23  ;;  %v3232_v22 = vld [vmem:[%s4951_s2 + $0x1f0] ss:$8 sps:$4 sm:$0xff]   ;;  %v3237_v23 = vld [vmem:[%s4951_s2 + $0xe4] ss:$8 sps:$4 sm:$0xff]  }
 0x101   : > { %1332 = vmatpush2.bf16.msra.mxu0 %v5114_v24  ;;  %v3240_v24 = vld [vmem:[%s4951_s2 + $0x1e4] ss:$8 sps:$4 sm:$0xff]  }
 0x102   : > { %1373 = vmatpush2.bf16.msra.mxu1 %v5115_v16  ;;  %1333 = vmatprep.subr.bf16.mxu0 %v5116_v59  ;;  %v3235_v16 = vld [vmem:[%s4951_s2 + $0xe0] ss:$8 sps:$4 sm:$0xff]  }
 0x103   : > { %1374 = vmatprep.subr.bf16.mxu1 %v5117_v57  ;;  %v3238_v59 = vld [vmem:[%s4951_s2 + $0x1e0] ss:$8 sps:$4 sm:$0xff]   ;;  %v3243_v57 = vld [vmem:[%s4951_s2 + $0xd4] ss:$8 sps:$4 sm:$0xff]  }
 0x105   : > { %1334 = vmatpush2.bf16.msra.mxu0 %v5118_v50  ;;  %v3246_v50 = vld [vmem:[%s4951_s2 + $0x1d4] ss:$8 sps:$4 sm:$0xff]  }
 0x106   : > { %1375 = vmatpush2.bf16.msra.mxu1 %v5119_v25  ;;  %1335 = vmatprep.subr.bf16.mxu0 %v5120_v11  ;;  %v3241_v25 = vld [vmem:[%s4951_s2 + $0xd0] ss:$8 sps:$4 sm:$0xff]  }
 0x107   : > { %1376 = vmatprep.subr.bf16.mxu1 %v5121_v62  ;;  %v3244_v11 = vld [vmem:[%s4951_s2 + $0x1d0] ss:$8 sps:$4 sm:$0xff]   ;;  %v3249_v62 = vld [vmem:[%s4951_s2 + $0xc4] ss:$8 sps:$4 sm:$0xff]  }
 0x109   : > { %1336 = vmatpush2.bf16.msra.mxu0 %v4215_v61  ;;  %v3186_v61 = vld [vmem:[%s4951_s2 + $0x174] ss:$8 sps:$4 sm:$0xff]  }
 0x10a   : > { %1377 = vmatpush2.bf16.msra.mxu1 %v5122_v46  ;;  %1337 = vmatprep.subr.bf16.mxu0 %v5123_v60  ;;  %v3252_v46 = vld [vmem:[%s4951_s2 + $0x1c4] ss:$8 sps:$4 sm:$0xff]   ;;  %v3247_v60 = vld [vmem:[%s4951_s2 + $0xc0] ss:$8 sps:$4 sm:$0xff]  }
 0x10b   : > { %1378 = vmatprep.subr.bf16.mxu1 %v5124_v0  ;;  %v3250_v0 = vld [vmem:[%s4951_s2 + $0x1c0] ss:$8 sps:$4 sm:$0xff]  }
 0x10d   : > { %1338 = vmatpush2.bf16.msra.mxu0 %v4243_v54  ;;  %v3181_v54 = vld [vmem:[%s4951_s2 + $0x70] ss:$8 sps:$4 sm:$0xff]  }
 0x10e   : > { %1379 = vmatpush2.bf16.msra.mxu1 %v4248_v20  ;;  %1339 = vmatprep.subr.bf16.mxu0 %v4253_v1  ;;  %v3189_v20 = vld [vmem:[%s4951_s2 + $0x64] ss:$8 sps:$4 sm:$0xff]  }
 0x10f   : > { %1380 = vmatprep.subr.bf16.mxu1 %v4258_v10  ;;  %v3184_v10 = vld [vmem:[%s4951_s2 + $0x170] ss:$8 sps:$4 sm:$0xff]  }
 0x111   : > { %1340 = vmatpush2.bf16.msra.mxu0 %v4269_v21  ;;  %v3192_v21 = vld [vmem:[%s4951_s2 + $0x164] ss:$8 sps:$4 sm:$0xff]  }
 0x112   : > { %1381 = vmatpush2.bf16.msra.mxu1 %v4274_v17  ;;  %2159 = vmatprep.subr.bf16.mxu0 %v3183_v26  ;;  %v3255_v26 = vld [vmem:[%s4951_s2 + $0xb4] ss:$8 sps:$4 sm:$0xff]  }
 0x113   : > { %2200 = vmatprep.subr.bf16.mxu1 %v3186_v61  ;;  %v3258_v61 = vld [vmem:[%s4951_s2 + $0x1b4] ss:$8 sps:$4 sm:$0xff]  }
 0x114   : > { %v1097_v1 = vpop.f32.mrf.mxu0  ;;  %1342 = vmatmul.mubr.bf16.vlgmr.msra.gmra.mxu0 %v5125_v29 }
 0x115   : > { %v1138_v17 = vpop.f32.mrf.mxu1  ;;  %1383 = vmatmul.mubr.bf16.vlgmr.msra.gmra.mxu1 %v5126_v30  ;;  %2160 = vmatpush1.bf16.msra.mxu0 %v3181_v54  ;;  %v3253_v54 = vld [vmem:[%s4951_s2 + $0xb0] ss:$8 sps:$4 sm:$0xff]  }
 0x116   : > { %v4488_v31 = vadd.f32 %v1138_v17, %v1097_v1  ;;  %2201 = vmatpush1.bf16.msra.mxu1 %v3184_v10  ;;  %v1099_v34 = vpop.f32.mrf.mxu0  ;;  %2161 = vmatprep.subr.bf16.mxu0 %v3189_v20  ;;  %v3256_v10 = vld [vmem:[%s4951_s2 + $0x1b0] ss:$8 sps:$4 sm:$0xff]   ;;  %v3261_v20 = vld [vmem:[%s4951_s2 + $0xa4] ss:$8 sps:$4 sm:$0xff]   ;;  %v3259_v1 = vld [vmem:[%s4951_s2 + $0xa0] ss:$8 sps:$4 sm:$0xff]  }
 0x117   : > { %v1140_v35 = vpop.f32.mrf.mxu1  ;;  %2202 = vmatprep.subr.bf16.mxu1 %v3192_v21  ;;  %2191 = vmatprep.mubr.bf16.mxu0 %v3765_v49  ;;  %v3201_v49 = vld [vmem:[%s4951_s2 + $0x44] ss:$8 sps:$4 sm:$0xff]   ;;  %v3262_v17 = vld [vmem:[%s4951_s2 + $0x1a0] ss:$8 sps:$4 sm:$0xff]  }
 0x118   : > { %v4502_v38 = vadd.f32 %v1140_v35, %v1099_v34  ;;  %2232 = vmatprep.mubr.bf16.mxu1 %v3775_v52  ;;  %v1101_v39 = vpop.f32.mrf.mxu0  ;;  %v3204_v52 = vld [vmem:[%s4951_s2 + $0x144] ss:$8 sps:$4 sm:$0xff]   ;;  %v3265_v34 = vld [vmem:[%s4951_s2 + $0x90] ss:$8 sps:$4 sm:$0xff]  }
 0x119   : > { %v1142_v40 = vpop.f32.mrf.mxu1  ;;  %2162 = vmatpush1.bf16.msra.mxu0 %v3187_v32  ;;  %v3264_v21 = vld [vmem:[%s4951_s2 + $0x1a4] ss:$8 sps:$4 sm:$0xff]   ;;  %v3267_v32 = vld [vmem:[%s4951_s2 + $0x94] ss:$8 sps:$4 sm:$0xff]   ;;  %v3268_v35 = vld [vmem:[%s4951_s2 + $0x190] ss:$8 sps:$4 sm:$0xff]  }
 0x11a   : > { %2203 = vmatpush1.bf16.msra.mxu1 %v3190_v33  ;;  %v1102_v43 = vpop.f32.mrf.mxu0  ;;  %2163 = vmatprep.subr.bf16.mxu0 %v3195_v36  ;;  %v3270_v33 = vld [vmem:[%s4951_s2 + $0x194] ss:$8 sps:$4 sm:$0xff]   ;;  %v3273_v36 = vld [vmem:[%s4951_s2 + $0x84] ss:$8 sps:$4 sm:$0xff]   ;;  %v3271_v39 = vld [vmem:[%s4951_s2 + $0x80] ss:$8 sps:$4 sm:$0xff]  }
 0x11b   : > { %v1143_v44 = vpop.f32.mrf.mxu1  ;;  %2204 = vmatprep.subr.bf16.mxu1 %v3198_v37  ;;  %v3276_v37 = vld [vmem:[%s4951_s2 + $0x184] ss:$8 sps:$4 sm:$0xff]   ;;  %v3274_v40 = vld [vmem:[%s4951_s2 + $0x180] ss:$8 sps:$4 sm:$0xff]   ;;  %v3277_v43 = vld [vmem:[%s4951_s2 + $0x270] ss:$8 sps:$4 sm:$0xff]  }
 0x11c   : > { %v3280_v44 = vld [vmem:[%s4951_s2 + $0x370] ss:$8 sps:$4 sm:$0xff]  }
 0x11d   : > { %2164 = vmatpush1.bf16.msra.mxu0 %v3193_v41  ;;  %v3279_v41 = vld [vmem:[%s4951_s2 + $0x274] ss:$8 sps:$4 sm:$0xff]  }
 0x11e   : > { %2205 = vmatpush1.bf16.msra.mxu1 %v3196_v42  ;;  %2165 = vmatprep.subr.bf16.mxu0 %v3201_v49  ;;  %v3282_v42 = vld [vmem:[%s4951_s2 + $0x374] ss:$8 sps:$4 sm:$0xff]   ;;  %v3285_v49 = vld [vmem:[%s4951_s2 + $0x264] ss:$8 sps:$4 sm:$0xff]  }
 0x11f   : > { %2206 = vmatprep.subr.bf16.mxu1 %v3204_v52  ;;  %v3288_v52 = vld [vmem:[%s4951_s2 + $0x364] ss:$8 sps:$4 sm:$0xff]  }
 0x121   : > { %2166 = vmatpush1.bf16.msra.mxu0 %v3199_v45 }
 0x122   : > { %2207 = vmatpush1.bf16.msra.mxu1 %v3202_v47  ;;  %2167 = vmatprep.subr.bf16.mxu0 %v3207_v48 }
 0x123   : > { %2208 = vmatprep.subr.bf16.mxu1 %v3210_v51  ;;  %v3283_v51 = vld [vmem:[%s4951_s2 + $0x260] ss:$8 sps:$4 sm:$0xff]  }
 0x125   : > { %2168 = vmatpush1.bf16.msra.mxu0 %v3205_v53  ;;  %v3286_v53 = vld [vmem:[%s4951_s2 + $0x360] ss:$8 sps:$4 sm:$0xff]  }
 0x126   : > { %2209 = vmatpush1.bf16.msra.mxu1 %v3208_v55  ;;  %2169 = vmatprep.subr.bf16.mxu0 %v3213_v56 }
 0x127   : > { %2210 = vmatprep.subr.bf16.mxu1 %v3216_v58 }
 0x129   : > { %2170 = vmatpush1.bf16.msra.mxu0 %v3211_v63 }
 0x12a   : > { %2211 = vmatpush1.bf16.msra.mxu1 %v3214_v2  ;;  %2171 = vmatprep.subr.bf16.mxu0 %v3219_v3 }
 0x12b   : > { %2212 = vmatprep.subr.bf16.mxu1 %v3222_v6  ;;  %v3289_v6 = vld [vmem:[%s4951_s2 + $0x250] ss:$8 sps:$4 sm:$0xff]  }
 0x12d   : > { %2172 = vmatpush1.bf16.msra.mxu0 %v3217_v7  ;;  %v3292_v7 = vld [vmem:[%s4951_s2 + $0x350] ss:$8 sps:$4 sm:$0xff]  }
 0x12e   : > { %2213 = vmatpush1.bf16.msra.mxu1 %v3220_v8  ;;  %2173 = vmatprep.subr.bf16.mxu0 %v3225_v9  ;;  %v3295_v9 = vld [vmem:[%s4951_s2 + $0x240] ss:$8 sps:$4 sm:$0xff]  }
 0x12f   : > { %2214 = vmatprep.subr.bf16.mxu1 %v3228_v12  ;;  %v3298_v12 = vld [vmem:[%s4951_s2 + $0x340] ss:$8 sps:$4 sm:$0xff]  }
 0x131   : > { %2174 = vmatpush1.bf16.msra.mxu0 %v3223_v13  ;;  %v3303_v13 = vld [vmem:[%s4951_s2 + $0x234] ss:$8 sps:$4 sm:$0xff]  }
 0x132   : > { %2215 = vmatpush1.bf16.msra.mxu1 %v3226_v14  ;;  %2175 = vmatprep.subr.bf16.mxu0 %v3231_v15  ;;  %v3306_v14 = vld [vmem:[%s4951_s2 + $0x334] ss:$8 sps:$4 sm:$0xff]   ;;  %v3301_v15 = vld [vmem:[%s4951_s2 + $0x230] ss:$8 sps:$4 sm:$0xff]  }
 0x133   : > { %2216 = vmatprep.subr.bf16.mxu1 %v3234_v18  ;;  %v3304_v18 = vld [vmem:[%s4951_s2 + $0x330] ss:$8 sps:$4 sm:$0xff]  }
 0x135   : > { %2176 = vmatpush2.bf16.msra.mxu0 %v3229_v19  ;;  %v3309_v19 = vld [vmem:[%s4951_s2 + $0x224] ss:$8 sps:$4 sm:$0xff]  }
 0x136   : > { %2217 = vmatpush2.bf16.msra.mxu1 %v3232_v22  ;;  %2177 = vmatprep.subr.bf16.mxu0 %v3237_v23  ;;  %v3312_v22 = vld [vmem:[%s4951_s2 + $0x324] ss:$8 sps:$4 sm:$0xff]   ;;  %v3307_v23 = vld [vmem:[%s4951_s2 + $0x220] ss:$8 sps:$4 sm:$0xff]  }
 0x137   : > { %2218 = vmatprep.subr.bf16.mxu1 %v3240_v24  ;;  %v3310_v24 = vld [vmem:[%s4951_s2 + $0x320] ss:$8 sps:$4 sm:$0xff]  }
 0x139   : > { %2178 = vmatpush2.bf16.msra.mxu0 %v3235_v16  ;;  %v3315_v16 = vld [vmem:[%s4951_s2 + $0x214] ss:$8 sps:$4 sm:$0xff]  }
 0x13a   : > { %2219 = vmatpush2.bf16.msra.mxu1 %v3238_v59  ;;  %2179 = vmatprep.subr.bf16.mxu0 %v3243_v57  ;;  %v3318_v59 = vld [vmem:[%s4951_s2 + $0x314] ss:$8 sps:$4 sm:$0xff]   ;;  %v3313_v57 = vld [vmem:[%s4951_s2 + $0x210] ss:$8 sps:$4 sm:$0xff]  }
 0x13b   : > { %2220 = vmatprep.subr.bf16.mxu1 %v3246_v50  ;;  %v3316_v50 = vld [vmem:[%s4951_s2 + $0x310] ss:$8 sps:$4 sm:$0xff]  }
 0x13d   : > { %2180 = vmatpush2.bf16.msra.mxu0 %v3241_v25  ;;  %v3321_v25 = vld [vmem:[%s4951_s2 + $0x204] ss:$8 sps:$4 sm:$0xff]  }
 0x13e   : > { %2221 = vmatpush2.bf16.msra.mxu1 %v3244_v11  ;;  %2181 = vmatprep.subr.bf16.mxu0 %v3249_v62  ;;  %v3324_v11 = vld [vmem:[%s4951_s2 + $0x304] ss:$8 sps:$4 sm:$0xff]   ;;  %v3319_v62 = vld [vmem:[%s4951_s2 + $0x200] ss:$8 sps:$4 sm:$0xff]  }
 0x13f   : > { %2222 = vmatprep.subr.bf16.mxu1 %v3252_v46  ;;  %v3322_v46 = vld [vmem:[%s4951_s2 + $0x300] ss:$8 sps:$4 sm:$0xff]  }
 0x141   : > { %2182 = vmatpush2.bf16.msra.mxu0 %v3247_v60  ;;  %v3327_v60 = vld [vmem:[%s4951_s2 + $0x2f4] ss:$8 sps:$4 sm:$0xff]  }
 0x142   : > { %2223 = vmatpush2.bf16.msra.mxu1 %v3250_v0  ;;  %2183 = vmatprep.subr.bf16.mxu0 %v3255_v26  ;;  %v3330_v0 = vld [vmem:[%s4951_s2 + $0x3f4] ss:$8 sps:$4 sm:$0xff]   ;;  %v3325_v26 = vld [vmem:[%s4951_s2 + $0x2f0] ss:$8 sps:$4 sm:$0xff]  }
 0x143   : > { %2224 = vmatprep.subr.bf16.mxu1 %v3258_v61  ;;  %v3328_v61 = vld [vmem:[%s4951_s2 + $0x3f0] ss:$8 sps:$4 sm:$0xff]  }
 0x145   : > { %2184 = vmatpush2.bf16.msra.mxu0 %v3253_v54  ;;  %v3333_v54 = vld [vmem:[%s4951_s2 + $0x2e4] ss:$8 sps:$4 sm:$0xff]  }
 0x146   : > { %2225 = vmatpush2.bf16.msra.mxu1 %v3256_v10  ;;  %2185 = vmatprep.subr.bf16.mxu0 %v3261_v20  ;;  %v3336_v10 = vld [vmem:[%s4951_s2 + $0x3e4] ss:$8 sps:$4 sm:$0xff]   ;;  %v3331_v20 = vld [vmem:[%s4951_s2 + $0x2e0] ss:$8 sps:$4 sm:$0xff]  }
 0x147   : > { %2226 = vmatprep.subr.bf16.mxu1 %v3264_v21  ;;  %v3334_v21 = vld [vmem:[%s4951_s2 + $0x3e0] ss:$8 sps:$4 sm:$0xff]  }
 0x149   : > { %2186 = vmatpush2.bf16.msra.mxu0 %v3259_v1  ;;  %v3339_v1 = vld [vmem:[%s4951_s2 + $0x2d4] ss:$8 sps:$4 sm:$0xff]  }
 0x14a   : > { %2227 = vmatpush2.bf16.msra.mxu1 %v3262_v17  ;;  %2187 = vmatprep.subr.bf16.mxu0 %v3267_v32  ;;  %v3342_v17 = vld [vmem:[%s4951_s2 + $0x3d4] ss:$8 sps:$4 sm:$0xff]   ;;  %v3337_v32 = vld [vmem:[%s4951_s2 + $0x2d0] ss:$8 sps:$4 sm:$0xff]  }
 0x14b   : > { %2228 = vmatprep.subr.bf16.mxu1 %v3270_v33  ;;  %v3340_v33 = vld [vmem:[%s4951_s2 + $0x3d0] ss:$8 sps:$4 sm:$0xff]  }
 0x14d   : > { %2188 = vmatpush2.bf16.msra.mxu0 %v3265_v34  ;;  %v3345_v34 = vld [vmem:[%s4951_s2 + $0x2c4] ss:$8 sps:$4 sm:$0xff]  }
 0x14e   : > { %2229 = vmatpush2.bf16.msra.mxu1 %v3268_v35  ;;  %2189 = vmatprep.subr.bf16.mxu0 %v3273_v36  ;;  %v3348_v35 = vld [vmem:[%s4951_s2 + $0x3c4] ss:$8 sps:$4 sm:$0xff]   ;;  %v3343_v36 = vld [vmem:[%s4951_s2 + $0x2c0] ss:$8 sps:$4 sm:$0xff]  }
 0x14f   : > { %2230 = vmatprep.subr.bf16.mxu1 %v3276_v37  ;;  %v3346_v37 = vld [vmem:[%s4951_s2 + $0x3c0] ss:$8 sps:$4 sm:$0xff]  }
 0x151   : > { %2190 = vmatpush2.bf16.msra.mxu0 %v3271_v39  ;;  %v3351_v39 = vld [vmem:[%s4951_s2 + $0x2b4] ss:$8 sps:$4 sm:$0xff]  }
 0x152   : > { %2231 = vmatpush2.bf16.msra.mxu1 %v3274_v40  ;;  %2241 = vmatprep.subr.bf16.mxu0 %v3279_v41  ;;  %v3354_v40 = vld [vmem:[%s4951_s2 + $0x3b4] ss:$8 sps:$4 sm:$0xff]   ;;  %v3349_v41 = vld [vmem:[%s4951_s2 + $0x2b0] ss:$8 sps:$4 sm:$0xff]  }
 0x153   : > { %2282 = vmatprep.subr.bf16.mxu1 %v3282_v42  ;;  %v3352_v42 = vld [vmem:[%s4951_s2 + $0x3b0] ss:$8 sps:$4 sm:$0xff]  }
 0x154   : > { %v1179_v45 = vpop.f32.mrf.mxu0  ;;  %2192 = vmatmul.mubr.bf16.vlgmr.msra.gmra.mxu0 %v3822_v4  ;;  %v3291_v4 = vld [vmem:[%s4951_s2 + $0x254] ss:$8 sps:$4 sm:$0xff]  }
 0x155   : > { %v1220_v47 = vpop.f32.mrf.mxu1  ;;  %2233 = vmatmul.mubr.bf16.vlgmr.msra.gmra.mxu1 %v3824_v5  ;;  %v1180_v48 = vadd.f32 %v1179_v45, %v4488_v31  ;;  %2242 = vmatpush1.bf16.msra.mxu0 %v3277_v43  ;;  %v3294_v5 = vld [vmem:[%s4951_s2 + $0x354] ss:$8 sps:$4 sm:$0xff]   ;;  %v3357_v43 = vld [vmem:[%s4951_s2 + $0x2a4] ss:$8 sps:$4 sm:$0xff]  }
 0x156   : > { %2283 = vmatpush1.bf16.msra.mxu1 %v3280_v44  ;;  %v1181_v55 = vpop.f32.mrf.mxu0  ;;  %2243 = vmatprep.subr.bf16.mxu0 %v3285_v49  ;;  %v3360_v44 = vld [vmem:[%s4951_s2 + $0x3a4] ss:$8 sps:$4 sm:$0xff]   ;;  %v3355_v49 = vld [vmem:[%s4951_s2 + $0x2a0] ss:$8 sps:$4 sm:$0xff]   ;;  %v3363_v45 = vld [vmem:[%s4951_s2 + $0x294] ss:$8 sps:$4 sm:$0xff]  }
 0x157   : > { %v1222_v56 = vpop.f32.mrf.mxu1  ;;  %2284 = vmatprep.subr.bf16.mxu1 %v3288_v52  ;;  %v4701_v31 = vadd.f32 %v1220_v47, %v1180_v48  ;;  %v1182_v58 = vadd.f32 %v1181_v55, %v4502_v38  ;;  %2273 = vmatprep.mubr.bf16.mxu0 %v5073_v27  ;;  %v3297_v27 = vld [vmem:[%s4951_s2 + $0x244] ss:$8 sps:$4 sm:$0xff]   ;;  %v3358_v52 = vld [vmem:[%s4951_s2 + $0x3a0] ss:$8 sps:$4 sm:$0xff]   ;;  %v3366_v47 = vld [vmem:[%s4951_s2 + $0x394] ss:$8 sps:$4 sm:$0xff]  }
 0x158   : > { %2314 = vmatprep.mubr.bf16.mxu1 %v5074_v28  ;;  %v1183_v63 = vpop.f32.mrf.mxu0  ;;  %v3300_v28 = vld [vmem:[%s4951_s2 + $0x344] ss:$8 sps:$4 sm:$0xff]   ;;  %v3361_v48 = vld [vmem:[%s4951_s2 + $0x290] ss:$8 sps:$4 sm:$0xff]  }
 0x159   : > { %v1224_v2 = vpop.f32.mrf.mxu1  ;;  %v4706_v3 = vadd.f32 %v1222_v56, %v1182_v58  ;;  %2244 = vmatpush1.bf16.msra.mxu0 %v3283_v51  ;;  %v3364_v51 = vld [vmem:[%s4951_s2 + $0x390] ss:$8 sps:$4 sm:$0xff]   ;;  %v3372_v55 = vld [vmem:[%s4951_s2 + $0x384] ss:$8 sps:$4 sm:$0xff]   ;;  %v3367_v56 = vld [vmem:[%s4951_s2 + $0x280] ss:$8 sps:$4 sm:$0xff]  }
 0x15a   : > { %2285 = vmatpush1.bf16.msra.mxu1 %v3286_v53  ;;  %v1184_v8 = vpop.f32.mrf.mxu0  ;;  %2245 = vmatprep.subr.bf16.mxu0 %v3291_v4  ;;  %v3369_v53 = vld [vmem:[%s4951_s2 + $0x284] ss:$8 sps:$4 sm:$0xff]   ;;  %v3370_v4 = vld [vmem:[%s4951_s2 + $0x380] ss:$8 sps:$4 sm:$0xff]  }
 0x15b   : > { %v1225_v38 = vpop.f32.mrf.mxu1  ;;  %2286 = vmatprep.subr.bf16.mxu1 %v3294_v5 }
 0x15d   : > { %2246 = vmatpush1.bf16.msra.mxu0 %v3289_v6 }
 0x15e   : > { %2287 = vmatpush1.bf16.msra.mxu1 %v3292_v7  ;;  %2247 = vmatprep.subr.bf16.mxu0 %v3297_v27 }
 0x15f   : > { %2288 = vmatprep.subr.bf16.mxu1 %v3300_v28 }
 0x161   : > { %2248 = vmatpush1.bf16.msra.mxu0 %v3295_v9 }
 0x162   : > { %2289 = vmatpush1.bf16.msra.mxu1 %v3298_v12  ;;  %2249 = vmatprep.subr.bf16.mxu0 %v3303_v13 }
 0x163   : > { %2290 = vmatprep.subr.bf16.mxu1 %v3306_v14 }
 0x165   : > { %2250 = vmatpush1.bf16.msra.mxu0 %v3301_v15 }
 0x166   : > { %2291 = vmatpush1.bf16.msra.mxu1 %v3304_v18  ;;  %2251 = vmatprep.subr.bf16.mxu0 %v3309_v19 }
 0x167   : > { %2292 = vmatprep.subr.bf16.mxu1 %v3312_v22 }
 0x169   : > { %2252 = vmatpush1.bf16.msra.mxu0 %v3307_v23 }
 0x16a   : > { %2293 = vmatpush1.bf16.msra.mxu1 %v3310_v24  ;;  %2253 = vmatprep.subr.bf16.mxu0 %v3315_v16 }
 0x16b   : > { %2294 = vmatprep.subr.bf16.mxu1 %v3318_v59  ;;  %v3461_v59 = vmov 0.0  }
 0x16c   : > { %250 = vst [vmem:[#allocation2] sm:$0xff] %v3461_v59  ;;  %254 = vst.msk [vmem:[#allocation2 + $0x28] sm:$0xff] %vm251_vm0, %v3461_v59 }
 0x16d   : > { %2254 = vmatpush1.bf16.msra.mxu0 %v3313_v57 }
 0x16e   : > { %2295 = vmatpush1.bf16.msra.mxu1 %v3316_v50  ;;  %2255 = vmatprep.subr.bf16.mxu0 %v3321_v25 }
 0x16f   : > { %2296 = vmatprep.subr.bf16.mxu1 %v3324_v11 }
 0x171   : > { %2256 = vmatpush1.bf16.msra.mxu0 %v3319_v62 }
 0x172   : > { %2297 = vmatpush1.bf16.msra.mxu1 %v3322_v46  ;;  %2257 = vmatprep.subr.bf16.mxu0 %v3327_v60 }
 0x173   : > { %2298 = vmatprep.subr.bf16.mxu1 %v3330_v0 }
 0x175   : > { %2258 = vmatpush2.bf16.msra.mxu0 %v3325_v26 }
 0x176   : > { %2299 = vmatpush2.bf16.msra.mxu1 %v3328_v61  ;;  %2259 = vmatprep.subr.bf16.mxu0 %v3333_v54 }
 0x177   : > { %2300 = vmatprep.subr.bf16.mxu1 %v3336_v10 }
 0x179   : > { %2260 = vmatpush2.bf16.msra.mxu0 %v3331_v20 }
 0x17a   : > { %2301 = vmatpush2.bf16.msra.mxu1 %v3334_v21  ;;  %2261 = vmatprep.subr.bf16.mxu0 %v3339_v1 }
 0x17b   : > { %2302 = vmatprep.subr.bf16.mxu1 %v3342_v17 }
 0x17d   : > { %2262 = vmatpush2.bf16.msra.mxu0 %v3337_v32 }
 0x17e   : > { %2303 = vmatpush2.bf16.msra.mxu1 %v3340_v33  ;;  %2263 = vmatprep.subr.bf16.mxu0 %v3345_v34 }
 0x17f   : > { %2304 = vmatprep.subr.bf16.mxu1 %v3348_v35 }
 0x181   : > { %2264 = vmatpush2.bf16.msra.mxu0 %v3343_v36 }
 0x182   : > { %2305 = vmatpush2.bf16.msra.mxu1 %v3346_v37  ;;  %2265 = vmatprep.subr.bf16.mxu0 %v3351_v39 }
 0x183   : > { %2306 = vmatprep.subr.bf16.mxu1 %v3354_v40  ;;  %v2347_v40 = vld [vmem:[#allocation2] sm:$0x80] }
 0x185   : > { %2266 = vmatpush2.bf16.msra.mxu0 %v3349_v41  ;;  %v2331_v41 = vld [vmem:[#allocation2] sm:$0xc0] }
 0x186   : > { %2307 = vmatpush2.bf16.msra.mxu1 %v3352_v42  ;;  %2267 = vmatprep.subr.bf16.mxu0 %v3357_v43 }
 0x187   : > { %2308 = vmatprep.subr.bf16.mxu1 %v3360_v44 }
 0x189   : > { %2268 = vmatpush2.bf16.msra.mxu0 %v3355_v49 }
 0x18a   : > { %2309 = vmatpush2.bf16.msra.mxu1 %v3358_v52  ;;  %2269 = vmatprep.subr.bf16.mxu0 %v3363_v45  ;;  %v2352_v52 = vrot.slane %v2347_v40, 2  ;;  %v2336_v45 = vrot.slane %v2331_v41, 1 }
 0x18b   : > { %2310 = vmatprep.subr.bf16.mxu1 %v3366_v47 }
 0x18d   : > { %2270 = vmatpush2.bf16.msra.mxu0 %v3361_v48 }
 0x18e   : > { %2311 = vmatpush2.bf16.msra.mxu1 %v3364_v51  ;;  %2271 = vmatprep.subr.bf16.mxu0 %v3369_v53  ;;  %v2384_v53 = vld [vmem:[#allocation2 + $0x28] sm:$0x3] }
 0x18f   : > { %2312 = vmatprep.subr.bf16.mxu1 %v3372_v55  ;;  %v2429_v55 = vld [vmem:[%s4953_s4 + $0x18] sm:$0xff] }
 0x191   : > { %2272 = vmatpush2.bf16.msra.mxu0 %v3367_v56 }
 0x192   : > { %2313 = vmatpush2.bf16.msra.mxu1 %v3370_v4  ;;  %2931 = vmatprep.subr.mxu0 %v3461_v59 }
 0x194   : > { %v1261_v5 = vpop.f32.mrf.mxu0  ;;  %2274 = vmatmul.mubr.bf16.vlgmr.msra.gmra.mxu0 %v5125_v29 }
 0x195   : > { %v1302_v58 = vpop.f32.mrf.mxu1  ;;  %2315 = vmatmul.mubr.bf16.vlgmr.msra.gmra.mxu1 %v5126_v30  ;;  %v1262_v63 = vadd.f32 %v1261_v5, %v4701_v31  ;;  %2932 = vmatpush3.msra.mxu0 %v2429_v55 }
 0x196   : > { %v1263_v2 = vpop.f32.mrf.mxu0  ;;  %2933 = vmatprep.subr.mxu0 %v3461_v59  ;;  %2939 = vmatprep.mubr.msk.f32.mxu0 %vm3465_vm4, %v3461_v59 }
 0x197   : > { %v1304_v6 = vpop.f32.mrf.mxu1  ;;  %v1303_v7 = vadd.f32 %v1302_v58, %v1262_v63  ;;  %v1264_v8 = vadd.f32 %v1263_v2, %v4706_v3  ;;  %v2389_v58 = vrot.slane %v2384_v53, 5  ;;  %v2428_v63 = vld [vmem:[%s4953_s4 + $0x10] sm:$0xff]  ;;  %v2400_v2 = vld [vmem:[#allocation2 + $0x28] sm:$0x7] }
 0x198   : > { %v1265_v38 = vpop.f32.mrf.mxu0  ;;  %2934 = vmatpush3.msra.mxu0 %v2428_v63 }
 0x199   : > { %v1306_v27 = vpop.f32.mrf.mxu1  ;;  %v1305_v28 = vadd.f32 %v1304_v6, %v1264_v8  ;;  %v2427_v6 = vld [vmem:[%s4953_s4 + $0x8] sm:$0xff]  ;;  %2935 = vmatprep.subr.mxu0 %v3461_v59  ;;  %v2405_v38 = vrot.slane %v2400_v2, 6 }
 0x19a   : > { %v1266_v9 = vpop.f32.mrf.mxu0  ;;  %2936 = vmatpush3.msra.mxu0 %v2427_v6  ;;  %v2426_v27 = vld [vmem:[%s4953_s4] sm:$0xff] }
 0x19b   : > { %v1307_v12 = vpop.f32.mrf.mxu1  ;;  %2937 = vmatprep.subr.mxu0 %v3461_v59 }
 0x19c   : > { %2938 = vmatpush3.msra.mxu0 %v2426_v27 }
 0x1d4   : > { %v1343_v13 = vpop.f32.mrf.mxu0 }
 0x1d5   : > { %v1384_v14 = vpop.f32.mrf.mxu1  ;;  %v1344_v15 = vadd.f32 %v1343_v13, %v1303_v7 }
 0x1d6   : > { %v1345_v18 = vpop.f32.mrf.mxu0 }
 0x1d7   : > { %v1386_v19 = vpop.f32.mrf.mxu1  ;;  %v1385_v29 = vadd.f32 %v1384_v14, %v1344_v15  ;;  %v1346_v22 = vadd.f32 %v1345_v18, %v1305_v28  ;;  %v2327_v14 = vld [vmem:[#allocation2] sm:$0xe0] }
 0x1d8   : > { %v1347_v30 = vpop.f32.mrf.mxu0 }
 0x1d9   : > { %v1388_v23 = vpop.f32.mrf.mxu1  ;;  %v1387_v31 = vadd.f32 %v1386_v19, %v1346_v22  ;;  %v2372_v19 = vld [vmem:[#allocation2 + $0x28] sm:$0x1] }
 0x1da   : > { %v1348_v24 = vpop.f32.mrf.mxu0 }
 0x1db   : > { %v1389_v16 = vpop.f32.mrf.mxu1 }
 0x214   : > { %v2193_v3 = vpop.f32.mrf.mxu0 }
 0x215   : > { %v2234_v57 = vpop.f32.mrf.mxu1 }
 0x216   : > { %v2195_v50 = vpop.f32.mrf.mxu0  ;;  %v2235_v0 = vadd.f32 %v2234_v57, %v2193_v3 }
 0x217   : > { %v2236_v25 = vpop.f32.mrf.mxu1 }
 0x218   : > { %v2197_v11 = vpop.f32.mrf.mxu0  ;;  %v2237_v54 = vadd.f32 %v2236_v25, %v2195_v50 }
 0x219   : > { %v2238_v62 = vpop.f32.mrf.mxu1 }
 0x21a   : > { %v2198_v46 = vpop.f32.mrf.mxu0 }
 0x21b   : > { %v2239_v60 = vpop.f32.mrf.mxu1 }
 0x254   : > { %v2275_v26 = vpop.f32.mrf.mxu0 }
 0x255   : > { %v2316_v61 = vpop.f32.mrf.mxu1  ;;  %v2276_v10 = vadd.f32 %v2275_v26, %v2235_v0  ;;  %v2918_v0 = vld [vmem:[%s4952_s3] ss:$0 sm:$0xff] }
 0x256   : > { %v2277_v20 = vpop.f32.mrf.mxu0 }
 0x257   : > { %v2318_v21 = vpop.f32.mrf.mxu1  ;;  %v2317_v1 = vadd.f32 %v2316_v61, %v2276_v10  ;;  %v2278_v17 = vadd.f32 %v2277_v20, %v2237_v54 }
 0x258   : > { %v2279_v32 = vpop.f32.mrf.mxu0 }
 0x259   : > { %v2320_v33 = vpop.f32.mrf.mxu1  ;;  %v2323_v34 = vadd.f32 %v2317_v1, %v1385_v29  ;;  %v2319_v35 = vadd.f32 %v2318_v21, %v2278_v17 }
 0x25a   : > { %v2280_v36 = vpop.f32.mrf.mxu0 }
 0x25b   : > { %v2321_v37 = vpop.f32.mrf.mxu1  ;;  %2325 = vst [vmem:[#allocation2 + $0x10] sm:$0xff] %v2323_v34  ;;  %v2324_v39 = vadd.f32 %v2319_v35, %v1387_v31  ;;  %v2365_v4 = vrot.slane %v2323_v34, 3  ;;  %v2377_v31 = vrot.slane %v2372_v19, 4 }
 0x25d   : > { %2326 = vst.msk [vmem:[#allocation2 + $0x18] sm:$0xff] %vm251_vm0, %v2324_v39  ;;  %v2508_v39 = vlaneseq }
 0x25f   : > { %v2509_v40 = vshrl.u32 %v2508_v39, 7 }
 0x261   : > { %v2511_v41 = vadd.s32 4294967293, %v2509_v40  ;;  %v2566_v6 = vadd.s32 3, %v2509_v40 }
 0x262   : > { %v2348_v42 = vld [vmem:[#allocation2 + $0x10] sm:$0x7f] }
 0x263   : > { %v2332_v43 = vld [vmem:[#allocation2 + $0x10] sm:$0x3f]  ;;  %v2353_v44 = vrot.slane %v2348_v42, 2  ;;  %v2522_v42 = vadd.s32 4294967294, %v2509_v40  ;;  %vm2512_vm8 = vcmp.ge.s32.totalorder %v2511_v41, 0  ;;  %vm2568_vm13 = vcmp.lt.s32.totalorder %v2566_v6, 8 }
 0x264   : > { %v2337_v49 = vrot.slane %v2332_v43, 1  ;;  %v2383_v51 = vld [vmem:[#allocation2 + $0x18] sm:$0xfc]  ;;  %v2328_v13 = vld [vmem:[#allocation2 + $0x10] sm:$0x1f]  ;;  %v2532_v43 = vadd.s32 4294967295, %v2509_v40 }
 0x265   : > { %2357 = vrot.lane.b32.xlu1 %v2353_v44, %s3462_s18  ;;  %v2354_v47 = vsel %vm2351_vm1, %v2352_v52, %v2353_v44  ;;  %v2388_v56 = vrot.slane %v2383_v51, 5  ;;  %v2399_v5 = vld [vmem:[#allocation2 + $0x18] sm:$0xf8]  ;;  %vm2523_vm9 = vcmp.ge.s32.totalorder %v2522_v42, 0 }
 0x266   : > { %2341 = vrot.lane.b32.xlu0 %v2337_v49, %s3463_s19  ;;  %v2338_v48 = vsel %vm2335_vm2, %v2336_v45, %v2337_v49  ;;  %v2404_v7 = vrot.slane %v2399_v5, 6  ;;  %v2371_v18 = vld [vmem:[#allocation2 + $0x18] sm:$0xfe]  ;;  %vm2533_vm10 = vcmp.ge.s32.totalorder %v2532_v43, 0  ;;  %v2556_v5 = vadd.s32 2, %v2509_v40 }
 0x267   : > { %v2390_v8 = vsel %vm2387_vm3, %v2388_v56, %v2389_v58  ;;  %v2376_v23 = vrot.slane %v2371_v18, 4  ;;  %v2920_v18 = vld [vmem:[%s4954_s5] ss:$0 sm:$0xff] }
 0x268   : > { %v2406_v28 = vsel %vm2403_vm5, %v2404_v7, %v2405_v38  ;;  %vm2558_vm12 = vcmp.lt.s32.totalorder %v2556_v5, 8 }
 0x269   : > { %2355 = vrot.lane.b32.xlu1 %v2354_v47, %s3462_s18  ;;  %v2378_v25 = vsel %vm2375_vm6, %v2376_v23, %v2377_v31 }
 0x26a   : > { %2339 = vrot.lane.b32.xlu0 %v2338_v48, %s3463_s19  ;;  %v2546_v48 = vadd.s32 1, %v2509_v40 }
 0x26c   : > { %vm2548_vm11 = vcmp.lt.s32.totalorder %v2546_v48, 8 }
 0x26d   : > { %2391 = vrot.lane.b32.xlu1 %v2388_v56, %s3463_s19 }
 0x26e   : > { %2366 = vrot.lane.b32.xlu0 %v2365_v4, %s3464_s9 }
 0x271   : > { %2407 = vrot.lane.b32.xlu1 %v2404_v7, %s3462_s18 }
 0x272   : > { %2393 = vrot.lane.b32.xlu0 %v2390_v8, %s3463_s19 }
 0x276   : > { %2409 = vrot.lane.b32.xlu0 %v2406_v28, %s3462_s18 }
 0x2d7   : > { %v2358_v9 = vpop.permute.xlu1 %2357 }
 0x2d8   : > { %v2342_v12 = vpop.permute.xlu0 %2341 }
 0x2d9   : > { %v2346_v15 = vadd.f32 %v2342_v12, %v2328_v13 }
 0x2db   : > { %v2356_v29 = vpop.permute.xlu1 %2355  ;;  %v2362_v24 = vadd.f32 %v2358_v9, %v2346_v15 }
 0x2dc   : > { %v2340_v22 = vpop.permute.xlu0 %2339 }
 0x2dd   : > { %v2345_v30 = vadd.f32 %v2340_v22, %v2327_v14 }
 0x2df   : > { %v2361_v16 = vadd.f32 %v2356_v29, %v2345_v30  ;;  %v2392_v59 = vpop.permute.xlu1 %2391 }
 0x2e0   : > { %v2367_v3 = vpop.permute.xlu0 %2366 }
 0x2e1   : > { %v2369_v57 = vadd.f32 %v2367_v3, %v2361_v16  ;;  %v2370_v50 = vadd.f32 %v2367_v3, %v2362_v24 }
 0x2e3   : > { %v2381_v11 = vadd.f32 %v2376_v23, %v2369_v57  ;;  %v2382_v62 = vadd.f32 %v2378_v25, %v2370_v50  ;;  %v2408_v26 = vpop.permute.xlu1 %2407 }
 0x2e4   : > { %v2394_v46 = vpop.permute.xlu0 %2393 }
 0x2e5   : > { %v2397_v60 = vadd.f32 %v2392_v59, %v2381_v11  ;;  %v2398_v54 = vadd.f32 %v2394_v46, %v2382_v62 }
 0x2e7   : > { %v2413_v61 = vadd.f32 %v2408_v26, %v2397_v60 }
 0x2e8   : > { %v2410_v10 = vpop.permute.xlu0 %2409 }
 0x2e9   : > { %v2422_v20 = vadd.f32 %v2918_v0, %v2413_v61  ;;  %v2414_v21 = vadd.f32 %v2410_v10, %v2398_v54 }
 0x2eb   : > { %v2424_v1 = vmax.f32 %v2422_v20, 0.0  ;;  %v2423_v17 = vadd.f32 %v2918_v0, %v2414_v21 }
 0x2ed   : > { %v2425_v32 = vmax.f32 %v2423_v17, 0.0  ;;  %v2432_v33 = vrot.slane %v2424_v1, 5 }
 0x2ef   : > { %v2433_v34 = vrot.slane %v2425_v32, 5 }
 0x2f1   : > { %v2434_v35 = vsel %vm2387_vm3, %v2432_v33, %v2433_v34 }
 0x2f2   : > { %2940 = vmatmul.mubr.msk.f32.vlgmr.msra.gmra.mxu0 %vm2435_vm7, %v2434_v35 }
 0x3b2   : > { %v2504_v36 = vpop.f32.mrf.mxu0 }
 0x3b3   : > { %2528 = vrot.lane.b32.xlu0 %v2504_v36, %s3463_s19  ;;  %2518 = vrot.lane.b32.xlu1 %v2504_v36, %s3466_s16  ;;  %v2510_v44 = vrot.slane %v2504_v36, 5  ;;  %s3469_s16 = smov [#allocation3]  }
 0x3b4   : > { %v2941_v37 = vpop.f32.mrf.mxu0 }
 0x3b5   : > { %v2515_v51 = vsel %vm2512_vm8, %v2510_v44, 0.0 }
 0x3b7   : > { %2538 = vrot.lane.b32.xlu0 %v2504_v36, %s3467_s17  ;;  %2542 = vrot.lane.b32.xlu1 %v2504_v36, %s3462_s18  ;;  %s242_s18 = sand.u32 1, %s3451_s22   ;;  %s3403_s17 = sshll.u32 %s3469_s16, 4  ;;  %s3404_s17 = int_to_ptr.vmem [resolvable:$false] %s3403_s17 }
 0x3b8   : > { %s2659_s19 = sshll.u32 %s242_s18, 3  ;;  %s2583_s14 = scalar_lea.sflag [#allocation4], %s242_s18 }
 0x3b9   : > { %s3405_s25 = scalar_lea.vmem %s3404_s17, 256 }
 0x3bb   : > { %2562 = vrot.lane.b32.xlu0 %v2504_v36, %s3464_s9  ;;  %2552 = vrot.lane.b32.xlu1 %v2504_v36, %s3468_s20  ;;  %s244_s9 = scalar_lea.vmem [#allocation3], %s2659_s19 }
 0x3bc   : > { %s2596_s29 = sshll.u32 %s244_s9, 4  ;;  %s2597_s29 = int_to_ptr.vmem [resolvable:$true] %s2596_s29 }
 0x3bd   : > { %s3399_s15 = scalar_lea.vmem %s2597_s29, 128  ;;  %p3406_p0 = scmp.lt.s32.totalorder %s2597_s29, %s3404_s17 }
 0x3be   : > { %p3400_p11 = scmp.ne.s32.totalorder %s2597_s29, %s3399_s15  ;;  %p3407_p1 = scmp.lt.s32.totalorder %s3405_s25, %s3399_s15 }
 0x3c0   : > { %p3401_p12 = pnand %p3400_p11, %p3543_p5  ;;  %p3408_p2 = por %p3407_p1, %p3406_p0 }
 0x3c2   : > { %p3402_p13 = pneg %p3401_p12 }
 0x3c4   : > { %p3409_p3 = pnand %p3408_p2, %p3402_p13 }
 0x425   : > { %v2529_v49 = vpop.permute.xlu0 %2528  ;;  %v2519_v52 = vpop.permute.xlu1 %2518 }
 0x426   : > { %v2531_v45 = vrot.slane %v2529_v49, 7  ;;  %v2521_v47 = vrot.slane %v2519_v52, 6 }
 0x428   : > { %v2526_v53 = vsel %vm2523_vm9, %v2521_v47, 0.0  ;;  %v2536_v58 = vsel %vm2533_vm10, %v2531_v45, 0.0 }
 0x429   : > { %v2527_v55 = vadd.f32 %v2526_v53, %v2515_v51  ;;  %v2539_v56 = vpop.permute.xlu0 %2538  ;;  %v2543_v4 = vpop.permute.xlu1 %2542 }
 0x42a   : > { %v2545_v63 = vrot.slane %v2543_v4, 1 }
 0x42b   : > { %v2537_v2 = vadd.f32 %v2536_v58, %v2527_v55 }
 0x42c   : > { %v2550_v27 = vsel %vm2548_vm11, %v2545_v63, 0.0 }
 0x42d   : > { %v2541_v7 = vadd.f32 %v2539_v56, %v2537_v2  ;;  %v2563_v8 = vpop.permute.xlu0 %2562  ;;  %v2553_v38 = vpop.permute.xlu1 %2552 }
 0x42e   : > { %v2565_v28 = vrot.slane %v2563_v8, 3  ;;  %v2555_v9 = vrot.slane %v2553_v38, 2 }
 0x42f   : > { %v2551_v12 = vadd.f32 %v2550_v27, %v2541_v7 }
 0x430   : > { %v2560_v13 = vsel %vm2558_vm12, %v2555_v9, 0.0  ;;  %v2570_v15 = vsel %vm2568_vm13, %v2565_v28, 0.0 }
 0x431   : > { %v2561_v14 = vadd.f32 %v2560_v13, %v2551_v12 }
 0x433   : > { %v2571_v19 = vadd.f32 %v2570_v15, %v2561_v14 }
 0x435   : > { %v2579_v29 = vadd.f32 %v2920_v18, %v2571_v19 }
 0x437   : > { %2581 = vst.msk [vmem:[%s244_s9] sm:$0xff] %vm2580_vm14, %v2579_v29 }
 0x438   : > { %3412 = shalt.err (!%p3409_p3)
}
 0x439   : > { %s3413_s20 = scalar_lea.hbm %s2594_s13, 128  ;;  %s3417_s11 = scalar_lea.hbm %s4955_s6, 256 }
 0x43a   : > { %p3414_p4 = scmp.ne.s32.totalorder %s2594_s13, %s3413_s20  ;;  %p3418_p9 = scmp.lt.s32.totalorder %s2594_s13, %s4955_s6 }
 0x43b   : > { %p3419_p10 = scmp.lt.s32.totalorder %s3417_s11, %s3413_s20 }
 0x43c   : > { %p3415_p7 = pnand %p3414_p4, %p3543_p5 }
 0x43d   : > { %p3420_p11 = por %p3419_p10, %p3418_p9 }
 0x43e   : > { %p3416_p8 = pneg %p3415_p7 }
 0x440   : > { %p3421_p12 = pnand %p3420_p11, %p3416_p8 }
 0x442   : > { %3424 = shalt.err (!%p3421_p12)
}
 0x443   : > { %2942 = dma.vmem_to_hbm [thread:$0]  (%p3543_p5), %s2597_s29, 128, %s2594_s13, %s2583_s14  }
 0x444 PF: > { %p2948_p13 = scmp.ge.s32.totalorder %s3459_s24, 2  ;;  %s2608_s9 = sand.u32 1, %s3447_s21  }
 0x445   : > { %s2609_s10 = scalar_lea.sflag [#allocation4], %s2608_s9 }
 0x446   : > { %p2945_p0 = pnand %p2948_p13, %p3547_p6 }
 0x448   : > { %p2946_p1 = pneg %p2945_p0 }
 0x44a   : > { %3442 = dma.done.wait (%p2946_p1), %s2609_s10, 128  }
 0x44b   : > { %3444 = vsyncadd (%p2946_p1), %s2609_s10, 4294967168  ;;  %p16_p2 = scmp.ge.s32.totalorder %s3530_s27, 4   ;;  %s5127_s21 = smov %s3451_s22 }
 0x44c   : > { %s5128_s22 = smov %s3455_s23  ;;  %s5129_s23 = smov %s3541_s30 }
 0x44d   : > { %s5130_s24 = smov %s3530_s27  ;;  %18 = sbr.rel (!%p16_p2) target bundleno = 3 (0x3), region = 79 }
 0x452   :  { %2614 = vsyncpa [#allocation4], 1 }
 0x453   :  { %2616 = vsyncpa [#allocation4 + $0x1], 1 }

</bundles_post_ra>
